<compile_context>
chip_gen: v5e
topology: v5e:2x2
jax: 0.10.0
libtpu: 0.0.40
codegen_flags: <defaults>
</compile_context>

<pallas_src>
import functools

import jax
import jax.numpy as jnp
from jax.experimental import pallas as pl
from jax.experimental.pallas import tpu as pltpu

_LANE = 128          # lane-pad decoder output widths to this
_LN_EPS = 1e-12      # BERT LayerNorm eps


def _pick_vmem_limit_bytes():
    """Per-generation VMEM budget: ~75% of physical, capped at 100 MiB."""
    cap = None
    try:
        info = pltpu.get_tpu_info()
        for attr in ("vmem_capacity_bytes", "vmem_size_bytes", "vmem_bytes"):
            v = getattr(info, attr, None)
            if v:
                cap = int(v)
                break
    except Exception:
        cap = None
    if not cap:
        cap = 64 * 1024 * 1024           # conservative (v7x-sized) fallback
    return int(min(cap - cap // 4, 100 * 1024 * 1024))


# ----------------------------------------------------------------------------
# Layer-gridded fused kernel: grid = (batch, layer)
# ----------------------------------------------------------------------------
def _bert_slu_kernel(
    x_ref,                  # (1, L, H)   embedding sum (pre-LN), this batch
    bias_ref,               # (1, 1, L)   additive attention mask
    emb_g_ref, emb_b_ref,   # (1, H)
    wq_ref, bq_ref,         # (1, nH, H, dh) bf16, (1, nH, 1, dh) f32  (scale folded in)
    wk_ref, bk_ref,
    wv_ref, bv_ref,
    wo_ref, bo_ref,         # (1, nH, dh, H) bf16, (1, 1, H) f32
    ln1_g_ref, ln1_b_ref,   # (1, 1, H)
    w1_ref, b1_ref,         # (1, H, F) bf16, (1, 1, F)
    w2_ref, b2_ref,         # (1, F, H) bf16, (1, 1, H)
    ln2_g_ref, ln2_b_ref,   # (1, 1, H)
    pool_w_ref, pool_b_ref, # (H, H) bf16, (1, H)
    slot_w_ref, slot_b_ref, # (H, 128) bf16, (1, 128)
    int_w_ref, int_b_ref,   # (H, 128) bf16, (1, 128)
    slot_out_ref,           # out: (1, L, 128)
    intent_out_ref,         # out: (1, 1, 128)
    x_scr,                  # scratch: (L, H) f32 residual stream (persistent)
    *, L, H, nH,
):
    dh = H // nH
    l = pl.program_id(1)
    last = pl.num_programs(1) - 1

    def layer_norm(v, g, b):
        mu = jnp.mean(v, axis=-1, keepdims=True)
        var = jnp.mean(jnp.square(v - mu), axis=-1, keepdims=True)
        return (v - mu) * jax.lax.rsqrt(var + _LN_EPS) * g + b

    # ---- embeddings -> LayerNorm (first layer step of each sequence) ----
    @pl.when(l == 0)
    def _():
        x0 = x_ref[0].astype(jnp.float32)                       # (L, H)
        x_scr[...] = layer_norm(x0, emb_g_ref[...], emb_b_ref[...])

    x = x_scr[...]                                              # (L, H) f32
    xc = jnp.broadcast_to(x.astype(jnp.bfloat16), (nH, L, H))   # head-batched

    # ---- self-attention (head-batched, leading-batch einsums only) ----
    q = jnp.einsum('hli,hid->hld', xc, wq_ref[0],
                   preferred_element_type=jnp.float32) + bq_ref[0]   # (nH,L,dh)
    k = jnp.einsum('hli,hid->hld', xc, wk_ref[0],
                   preferred_element_type=jnp.float32) + bk_ref[0]
    v = jnp.einsum('hli,hid->hld', xc, wv_ref[0],
                   preferred_element_type=jnp.float32) + bv_ref[0]

    s = jnp.einsum('hqd,hkd->hqk', q.astype(jnp.bfloat16),
                   k.astype(jnp.bfloat16),
                   preferred_element_type=jnp.float32)               # (nH,L,L)
    s = s + bias_ref[0]                                              # (1,L) bcast
    s = s - jnp.max(s, axis=-1, keepdims=True)
    p = jnp.exp(s)
    p = p * pl.reciprocal(jnp.sum(p, axis=-1, keepdims=True), approx=True)

    ctx = jnp.einsum('hqk,hkd->hqd', p.astype(jnp.bfloat16),
                     v.astype(jnp.bfloat16),
                     preferred_element_type=jnp.float32)             # (nH,L,dh)
    attn = jnp.einsum('hqd,hdj->hqj', ctx.astype(jnp.bfloat16), wo_ref[0],
                      preferred_element_type=jnp.float32)            # (nH,L,H)
    attn = jnp.sum(attn, axis=0) + bo_ref[0]                         # (L, H)
    x = layer_norm(x + attn, ln1_g_ref[0], ln1_b_ref[0])             # residual

    # ---- feed-forward ----
    h1 = jnp.dot(x.astype(jnp.bfloat16), w1_ref[0],
                 preferred_element_type=jnp.float32) + b1_ref[0]
    # TODO(synk): PyTorch BERT uses exact erf GELU; tanh approximation kept
    # here (small numeric divergence) because it lowers cleanly on Mosaic.
    h1 = jax.nn.gelu(h1, approximate=True)
    h2 = jnp.dot(h1.astype(jnp.bfloat16), w2_ref[0],
                 preferred_element_type=jnp.float32) + b2_ref[0]
    x = layer_norm(x + h2, ln2_g_ref[0], ln2_b_ref[0])               # residual
    x_scr[...] = x

    # ---- decoders: only on the last layer step of each sequence ----
    @pl.when(l == last)
    def _():
        xb = x.astype(jnp.bfloat16)
        # slot decoder: project every position (lane-dense 128-wide output)
        slot_out_ref[0] = (
            jnp.dot(xb, slot_w_ref[...], preferred_element_type=jnp.float32)
            + slot_b_ref[...]).astype(slot_out_ref.dtype)
        # intent decoder: CLS row -> pooler(tanh) -> intent logits
        cls = xb[0:1, :]                                             # (1, H)
        sent = jnp.tanh(
            jnp.dot(cls, pool_w_ref[...], preferred_element_type=jnp.float32)
            + pool_b_ref[...])
        intent_out_ref[0] = (
            jnp.dot(sent.astype(jnp.bfloat16), int_w_ref[...],
                    preferred_element_type=jnp.float32)
            + int_b_ref[...]).astype(intent_out_ref.dtype)


# ----------------------------------------------------------------------------
# One-time (outside jit) weight re-layout: head-major QKV/WO, bf16 cast,
# 1/sqrt(dh) folded into Q, decoder weights lane-padded to 128.
# ----------------------------------------------------------------------------
def prepare_params(params, *, num_heads):
    H = params["word_emb"].shape[1]
    nL = params["wqkv"].shape[0]
    F = params["w1"].shape[2]
    nH = num_heads
    dh = H // nH
    scale = 1.0 / float(dh) ** 0.5
    n_slot = params["slot_w"].shape[1]
    n_intent = params["intent_w"].shape[1]
    bf16 = jnp.bfloat16

    wqkv, bqkv = params["wqkv"], params["bqkv"]

    def head_major_w(w):      # (nL, H, H) -> (nL, nH, H, dh)
        return jnp.transpose(w.reshape(nL, H, nH, dh), (0, 2, 1, 3))

    def head_major_b(b):      # (nL, H) -> (nL, nH, 1, dh)
        return b.reshape(nL, nH, 1, dh)

    w_q = head_major_w(wqkv[:, :, 0 * H:1 * H]) * scale
    w_k = head_major_w(wqkv[:, :, 1 * H:2 * H])
    w_v = head_major_w(wqkv[:, :, 2 * H:3 * H])
    b_q = head_major_b(bqkv[:, 0 * H:1 * H]) * scale
    b_k = head_major_b(bqkv[:, 1 * H:2 * H])
    b_v = head_major_b(bqkv[:, 2 * H:3 * H])
    w_o = params["wo"].reshape(nL, nH, dh, H)

    slot_w = jnp.pad(params["slot_w"], ((0, 0), (0, _LANE - n_slot)))
    slot_b = jnp.pad(params["slot_b"], ((0, _LANE - n_slot),)).reshape(1, _LANE)
    int_w = jnp.pad(params["intent_w"], ((0, 0), (0, _LANE - n_intent)))
    int_b = jnp.pad(params["intent_b"], ((0, _LANE - n_intent),)).reshape(1, _LANE)

    return {
        # embedding glue (kept f32; gathered in plain JAX)
        "word_emb": params["word_emb"],
        "seg_emb": params["seg_emb"],
        "pos_emb": params["pos_emb"],
        "emb_ln_g": params["emb_ln_g"].reshape(1, H),
        "emb_ln_b": params["emb_ln_b"].reshape(1, H),
        # per-layer encoder weights (bf16, head-major attention layout)
        "w_q": w_q.astype(bf16), "b_q": b_q,
        "w_k": w_k.astype(bf16), "b_k": b_k,
        "w_v": w_v.astype(bf16), "b_v": b_v,
        "w_o": w_o.astype(bf16), "b_o": params["bo"].reshape(nL, 1, H),
        "ln1_g": params["ln1_g"].reshape(nL, 1, H),
        "ln1_b": params["ln1_b"].reshape(nL, 1, H),
        "w1": params["w1"].astype(bf16), "b1": params["b1"].reshape(nL, 1, F),
        "w2": params["w2"].astype(bf16), "b2": params["b2"].reshape(nL, 1, H),
        "ln2_g": params["ln2_g"].reshape(nL, 1, H),
        "ln2_b": params["ln2_b"].reshape(nL, 1, H),
        # pooler + decoders (decoder weights lane-padded here, once)
        "pool_w": params["pooler_w"].astype(bf16),
        "pool_b": params["pooler_b"].reshape(1, H),
        "slot_w": slot_w.astype(bf16), "slot_b": slot_b,
        "int_w": int_w.astype(bf16), "int_b": int_b,
    }


# ----------------------------------------------------------------------------
# Wrapper: gathers (glue) + one layer-gridded pallas_call + output slicing
# ----------------------------------------------------------------------------
def bert_slu_forward(prep, token_ids, segment_ids, nwp_index, input_mask,
                     *, num_heads, n_slot, n_intent):
    """Eval-mode BertSLU forward: returns {'slot': logits, 'intent': logits}."""
    B, L = token_ids.shape
    H = prep["word_emb"].shape[1]
    nL = prep["w_q"].shape[0]
    nH = num_heads
    dh = H // nH
    F = prep["w1"].shape[2]

    # embedding sum (gather glue; no clean Pallas equivalent at this scale)
    pos_ids = jnp.arange(L)
    x = (prep["word_emb"][token_ids]
         + prep["seg_emb"][segment_ids]
         + prep["pos_emb"][pos_ids][None, :, :])                  # (B, L, H)

    # additive attention mask, kept small: (B, 1, L)
    mask_bias = ((1.0 - input_mask.astype(jnp.float32)) * -1e9).reshape(B, 1, L)

    kernel = functools.partial(_bert_slu_kernel, L=L, H=H, nH=nH)

    in_specs = [
        pl.BlockSpec((1, L, H), lambda b, l: (b, 0, 0)),             # x
        pl.BlockSpec((1, 1, L), lambda b, l: (b, 0, 0)),             # mask bias
        pl.BlockSpec((1, H), lambda b, l: (0, 0)),                   # emb_ln_g
        pl.BlockSpec((1, H), lambda b, l: (0, 0)),                   # emb_ln_b
        pl.BlockSpec((1, nH, H, dh), lambda b, l: (l, 0, 0, 0)),     # w_q
        pl.BlockSpec((1, nH, 1, dh), lambda b, l: (l, 0, 0, 0)),     # b_q
        pl.BlockSpec((1, nH, H, dh), lambda b, l: (l, 0, 0, 0)),     # w_k
        pl.BlockSpec((1, nH, 1, dh), lambda b, l: (l, 0, 0, 0)),     # b_k
        pl.BlockSpec((1, nH, H, dh), lambda b, l: (l, 0, 0, 0)),     # w_v
        pl.BlockSpec((1, nH, 1, dh), lambda b, l: (l, 0, 0, 0)),     # b_v
        pl.BlockSpec((1, nH, dh, H), lambda b, l: (l, 0, 0, 0)),     # w_o
        pl.BlockSpec((1, 1, H), lambda b, l: (l, 0, 0)),             # b_o
        pl.BlockSpec((1, 1, H), lambda b, l: (l, 0, 0)),             # ln1_g
        pl.BlockSpec((1, 1, H), lambda b, l: (l, 0, 0)),             # ln1_b
        pl.BlockSpec((1, H, F), lambda b, l: (l, 0, 0)),             # w1
        pl.BlockSpec((1, 1, F), lambda b, l: (l, 0, 0)),             # b1
        pl.BlockSpec((1, F, H), lambda b, l: (l, 0, 0)),             # w2
        pl.BlockSpec((1, 1, H), lambda b, l: (l, 0, 0)),             # b2
        pl.BlockSpec((1, 1, H), lambda b, l: (l, 0, 0)),             # ln2_g
        pl.BlockSpec((1, 1, H), lambda b, l: (l, 0, 0)),             # ln2_b
        pl.BlockSpec((H, H), lambda b, l: (0, 0)),                   # pool_w
        pl.BlockSpec((1, H), lambda b, l: (0, 0)),                   # pool_b
        pl.BlockSpec((H, _LANE), lambda b, l: (0, 0)),               # slot_w
        pl.BlockSpec((1, _LANE), lambda b, l: (0, 0)),               # slot_b
        pl.BlockSpec((H, _LANE), lambda b, l: (0, 0)),               # int_w
        pl.BlockSpec((1, _LANE), lambda b, l: (0, 0)),               # int_b
    ]
    out_specs = [
        pl.BlockSpec((1, L, _LANE), lambda b, l: (b, 0, 0)),         # slot logits
        pl.BlockSpec((1, 1, _LANE), lambda b, l: (b, 0, 0)),         # intent logits
    ]

    slot_all, intent_pad = pl.pallas_call(
        kernel,
        out_shape=(jax.ShapeDtypeStruct((B, L, _LANE), jnp.float32),
                   jax.ShapeDtypeStruct((B, 1, _LANE), jnp.float32)),
        grid_spec=pltpu.PrefetchScalarGridSpec(
            num_scalar_prefetch=0,
            grid=(B, nL),
            in_specs=in_specs,
            out_specs=out_specs,
            scratch_shapes=[pltpu.VMEM((L, H), jnp.float32)]),
        compiler_params=pltpu.CompilerParams(
            dimension_semantics=("parallel", "arbitrary"),
            vmem_limit_bytes=_pick_vmem_limit_bytes()),
    )(
        x, mask_bias,
        prep["emb_ln_g"], prep["emb_ln_b"],
        prep["w_q"], prep["b_q"], prep["w_k"], prep["b_k"],
        prep["w_v"], prep["b_v"],
        prep["w_o"], prep["b_o"], prep["ln1_g"], prep["ln1_b"],
        prep["w1"], prep["b1"], prep["w2"], prep["b2"],
        prep["ln2_g"], prep["ln2_b"],
        prep["pool_w"], prep["pool_b"],
        prep["slot_w"], prep["slot_b"], prep["int_w"], prep["int_b"],
    )

    # non-word-piece gather (project-then-gather == gather-then-project)
    slot_logits = jnp.take_along_axis(
        slot_all, nwp_index[..., None], axis=1)[:, :, :n_slot]
    intent_logits = intent_pad[:, 0, :n_intent]
    return {"slot": slot_logits, "intent": intent_logits}


# ----------------------------------------------------------------------------
# Params (stacked per-layer weights) + pure-JAX reference for verification
# ----------------------------------------------------------------------------
def init_params(key, *, vocab=100, max_len=16, hidden=32, num_heads=4,
                ffn=64, num_layers=2, n_slot=6, n_intent=5):
    del num_heads  # static config, not stored in traced params
    std = 0.02
    keys = iter(jax.random.split(key, 16))

    def w(shape):
        return jax.random.normal(next(keys), shape, jnp.float32) * std

    H, F, nL = hidden, ffn, num_layers
    return {
        "word_emb": w((vocab, H)),
        "seg_emb": w((2, H)),
        "pos_emb": w((max_len, H)),
        "emb_ln_g": jnp.ones((H,), jnp.float32),
        "emb_ln_b": jnp.zeros((H,), jnp.float32),
        "wqkv": w((nL, H, 3 * H)), "bqkv": jnp.zeros((nL, 3 * H), jnp.float32),
        "wo": w((nL, H, H)), "bo": jnp.zeros((nL, H), jnp.float32),
        "ln1_g": jnp.ones((nL, H), jnp.float32),
        "ln1_b": jnp.zeros((nL, H), jnp.float32),
        "w1": w((nL, H, F)), "b1": jnp.zeros((nL, F), jnp.float32),
        "w2": w((nL, F, H)), "b2": jnp.zeros((nL, H), jnp.float32),
        "ln2_g": jnp.ones((nL, H), jnp.float32),
        "ln2_b": jnp.zeros((nL, H), jnp.float32),
        "pooler_w": w((H, H)), "pooler_b": jnp.zeros((H,), jnp.float32),
        "slot_w": w((H, n_slot)), "slot_b": jnp.zeros((n_slot,), jnp.float32),
        "intent_w": w((H, n_intent)), "intent_b": jnp.zeros((n_intent,), jnp.float32),
    }


def _reference_forward(params, token_ids, segment_ids, nwp_index, input_mask,
                       num_heads):
    B, L = token_ids.shape
    H = params["word_emb"].shape[1]
    nL = params["wqkv"].shape[0]
    dh = H // num_heads
    scale = 1.0 / dh ** 0.5

    def ln(v, g, b):
        mu = v.mean(-1, keepdims=True)
        var = ((v - mu) ** 2).mean(-1, keepdims=True)
        return (v - mu) / jnp.sqrt(var + _LN_EPS) * g + b

    x = (params["word_emb"][token_ids] + params["seg_emb"][segment_ids]
         + params["pos_emb"][jnp.arange(L)][None])
    x = ln(x, params["emb_ln_g"], params["emb_ln_b"])
    bias = (1.0 - input_mask.astype(jnp.float32)) * -1e9

    for l in range(nL):
        qkv = x @ params["wqkv"][l] + params["bqkv"][l]
        q, k, v = jnp.split(qkv, 3, axis=-1)
        sh = lambda t: t.reshape(B, L, num_heads, dh).transpose(0, 2, 1, 3)
        s = jnp.einsum('bhqd,bhkd->bhqk', sh(q), sh(k)) * scale
        s = s + bias[:, None, None, :]
        p = jax.nn.softmax(s, axis=-1)
        ctx = jnp.einsum('bhqk,bhkd->bhqd', p, sh(v)).transpose(0, 2, 1, 3)
        attn = ctx.reshape(B, L, H) @ params["wo"][l] + params["bo"][l]
        x = ln(x + attn, params["ln1_g"][l], params["ln1_b"][l])
        h1 = jax.nn.gelu(x @ params["w1"][l] + params["b1"][l], approximate=True)
        h2 = h1 @ params["w2"][l] + params["b2"][l]
        x = ln(x + h2, params["ln2_g"][l], params["ln2_b"][l])

    token_reps = jnp.take_along_axis(x, nwp_index[..., None], axis=1)
    slot = token_reps @ params["slot_w"] + params["slot_b"]
    sent = jnp.tanh(x[:, 0, :] @ params["pooler_w"] + params["pooler_b"])
    intent = sent @ params["intent_w"] + params["intent_b"]
    return {"slot": slot, "intent": intent}


# ----------------------------------------------------------------------------
if __name__ == "__main__":
    key = jax.random.PRNGKey(0)
    pkey, dkey = jax.random.split(key)

    B, L, Lw = 2, 8, 6
    H, nH, F, nLayers = 32, 4, 64, 2
    n_slot, n_intent = 6, 5

    params = init_params(pkey, vocab=100, max_len=16, hidden=H, num_heads=nH,
                         ffn=F, num_layers=nLayers, n_slot=n_slot,
                         n_intent=n_intent)
    prep = prepare_params(params, num_heads=nH)      # once, outside jit

    token_ids = jax.random.randint(dkey, (B, L), 1, 100, dtype=jnp.int32)
    token_ids = token_ids.at[:, 0].set(0)                      # CLS id
    segment_ids = jnp.zeros((B, L), dtype=jnp.int32)
    nwp_index = jnp.broadcast_to(jnp.arange(1, Lw + 1, dtype=jnp.int32), (B, Lw))
    input_mask = jnp.ones((B, L), dtype=jnp.int32).at[1, L - 1].set(0)

    fwd = jax.jit(functools.partial(bert_slu_forward, num_heads=nH,
                                    n_slot=n_slot, n_intent=n_intent))
    out = fwd(prep, token_ids, segment_ids, nwp_index, input_mask)
    jax.block_until_ready(out)

    assert out["slot"].shape == (B, Lw, n_slot)
    assert out["intent"].shape == (B, n_intent)

    ref = _reference_forward(params, token_ids, segment_ids, nwp_index,
                             input_mask, nH)
    # bf16 matmuls + approx-reciprocal softmax => ~1e-3 level error; 1e-2 budget.
    assert jnp.allclose(out["slot"], ref["slot"], atol=1e-2, rtol=1e-2)
    assert jnp.allclose(out["intent"], ref["intent"], atol=1e-2, rtol=1e-2)

    print("KERNEL_OK")
</pallas_src>

<mosaic_0001>
module attributes {stable_mosaic.version = 11 : i64} {
  func.func @_bert_slu_kernel(%arg0: i32, %arg1: i32, %arg2: memref<1x8x32xf32, #tpu.memory_space<vmem>>, %arg3: memref<1x1x8xf32, #tpu.memory_space<vmem>>, %arg4: memref<1x32xf32, #tpu.memory_space<vmem>>, %arg5: memref<1x32xf32, #tpu.memory_space<vmem>>, %arg6: memref<1x4x32x8xbf16, #tpu.memory_space<vmem>>, %arg7: memref<1x4x1x8xf32, #tpu.memory_space<vmem>>, %arg8: memref<1x4x32x8xbf16, #tpu.memory_space<vmem>>, %arg9: memref<1x4x1x8xf32, #tpu.memory_space<vmem>>, %arg10: memref<1x4x32x8xbf16, #tpu.memory_space<vmem>>, %arg11: memref<1x4x1x8xf32, #tpu.memory_space<vmem>>, %arg12: memref<1x4x8x32xbf16, #tpu.memory_space<vmem>>, %arg13: memref<1x1x32xf32, #tpu.memory_space<vmem>>, %arg14: memref<1x1x32xf32, #tpu.memory_space<vmem>>, %arg15: memref<1x1x32xf32, #tpu.memory_space<vmem>>, %arg16: memref<1x32x64xbf16, #tpu.memory_space<vmem>>, %arg17: memref<1x1x64xf32, #tpu.memory_space<vmem>>, %arg18: memref<1x64x32xbf16, #tpu.memory_space<vmem>>, %arg19: memref<1x1x32xf32, #tpu.memory_space<vmem>>, %arg20: memref<1x1x32xf32, #tpu.memory_space<vmem>>, %arg21: memref<1x1x32xf32, #tpu.memory_space<vmem>>, %arg22: memref<32x32xbf16, #tpu.memory_space<vmem>>, %arg23: memref<1x32xf32, #tpu.memory_space<vmem>>, %arg24: memref<32x128xbf16, #tpu.memory_space<vmem>>, %arg25: memref<1x128xf32, #tpu.memory_space<vmem>>, %arg26: memref<32x128xbf16, #tpu.memory_space<vmem>>, %arg27: memref<1x128xf32, #tpu.memory_space<vmem>>, %arg28: memref<1x8x128xf32, #tpu.memory_space<vmem>>, %arg29: memref<1x1x128xf32, #tpu.memory_space<vmem>>, %arg30: memref<8x32xf32, #tpu.memory_space<vmem>>) attributes {dimension_semantics = [#tpu.dimension_semantics<parallel>, #tpu.dimension_semantics<arbitrary>], iteration_bounds = array<i64: 2, 2>, scalar_prefetch = 0 : i64, scratch_operands = 1 : i64, tpu.core_type = #tpu.core_type<tc>, window_params = [{transform_indices = @transform_0, window_bounds = array<i64: 1, 8, 32>}, {transform_indices = @transform_1, window_bounds = array<i64: 1, 1, 8>}, {pipeline_mode = #tpu.pipeline_mode<synchronous>, transform_indices = @transform_2, window_bounds = array<i64: 1, 32>}, {pipeline_mode = #tpu.pipeline_mode<synchronous>, transform_indices = @transform_3, window_bounds = array<i64: 1, 32>}, {transform_indices = @transform_4, window_bounds = array<i64: 1, 4, 32, 8>}, {transform_indices = @transform_5, window_bounds = array<i64: 1, 4, 1, 8>}, {transform_indices = @transform_6, window_bounds = array<i64: 1, 4, 32, 8>}, {transform_indices = @transform_7, window_bounds = array<i64: 1, 4, 1, 8>}, {transform_indices = @transform_8, window_bounds = array<i64: 1, 4, 32, 8>}, {transform_indices = @transform_9, window_bounds = array<i64: 1, 4, 1, 8>}, {transform_indices = @transform_10, window_bounds = array<i64: 1, 4, 8, 32>}, {transform_indices = @transform_11, window_bounds = array<i64: 1, 1, 32>}, {transform_indices = @transform_12, window_bounds = array<i64: 1, 1, 32>}, {transform_indices = @transform_13, window_bounds = array<i64: 1, 1, 32>}, {transform_indices = @transform_14, window_bounds = array<i64: 1, 32, 64>}, {transform_indices = @transform_15, window_bounds = array<i64: 1, 1, 64>}, {transform_indices = @transform_16, window_bounds = array<i64: 1, 64, 32>}, {transform_indices = @transform_17, window_bounds = array<i64: 1, 1, 32>}, {transform_indices = @transform_18, window_bounds = array<i64: 1, 1, 32>}, {transform_indices = @transform_19, window_bounds = array<i64: 1, 1, 32>}, {pipeline_mode = #tpu.pipeline_mode<synchronous>, transform_indices = @transform_20, window_bounds = array<i64: 32, 32>}, {pipeline_mode = #tpu.pipeline_mode<synchronous>, transform_indices = @transform_21, window_bounds = array<i64: 1, 32>}, {pipeline_mode = #tpu.pipeline_mode<synchronous>, transform_indices = @transform_22, window_bounds = array<i64: 32, 128>}, {pipeline_mode = #tpu.pipeline_mode<synchronous>, transform_indices = @transform_23, window_bounds = array<i64: 1, 128>}, {pipeline_mode = #tpu.pipeline_mode<synchronous>, transform_indices = @transform_24, window_bounds = array<i64: 32, 128>}, {pipeline_mode = #tpu.pipeline_mode<synchronous>, transform_indices = @transform_25, window_bounds = array<i64: 1, 128>}, {transform_indices = @transform_26, window_bounds = array<i64: 1, 8, 128>}, {transform_indices = @transform_27, window_bounds = array<i64: 1, 1, 128>}]} {
    %c0_i32 = arith.constant 0 : i32
    %0 = arith.cmpi eq, %arg1, %c0_i32 : i32
    %1 = arith.extui %0 : i1 to i32
    %c0_i32_0 = arith.constant 0 : i32
    %2 = arith.cmpi ne, %1, %c0_i32_0 : i32
    scf.if %2 {
      %c0_87 = arith.constant 0 : index
      %c0_88 = arith.constant 0 : index
      %c0_89 = arith.constant 0 : index
      %145 = vector.load %arg2[%c0_87, %c0_88, %c0_89] : memref<1x8x32xf32, #tpu.memory_space<vmem>>, vector<1x8x32xf32>
      %146 = vector.shape_cast %145 : vector<1x8x32xf32> to vector<8x32xf32>
      %c0_90 = arith.constant 0 : index
      %c0_91 = arith.constant 0 : index
      %147 = vector.load %arg4[%c0_90, %c0_91] : memref<1x32xf32, #tpu.memory_space<vmem>>, vector<1x32xf32>
      %c0_92 = arith.constant 0 : index
      %c0_93 = arith.constant 0 : index
      %148 = vector.load %arg5[%c0_92, %c0_93] : memref<1x32xf32, #tpu.memory_space<vmem>>, vector<1x32xf32>
      %cst_94 = arith.constant dense<0.000000e+00> : vector<8xf32>
      %149 = vector.multi_reduction <add>, %146, %cst_94 [1] : vector<8x32xf32> to vector<8xf32>
      %150 = vector.shape_cast %149 : vector<8xf32> to vector<8x1xf32>
      %cst_95 = arith.constant 3.200000e+01 : f32
      %151 = vector.broadcast %cst_95 : f32 to vector<8x1xf32>
      %152 = arith.divf %150, %151 : vector<8x1xf32>
      %153 = vector.broadcast %152 : vector<8x1xf32> to vector<8x32xf32>
      %154 = arith.subf %146, %153 : vector<8x32xf32>
      %155 = arith.mulf %154, %154 : vector<8x32xf32>
      %cst_96 = arith.constant dense<0.000000e+00> : vector<8xf32>
      %156 = vector.multi_reduction <add>, %155, %cst_96 [1] : vector<8x32xf32> to vector<8xf32>
      %157 = vector.shape_cast %156 : vector<8xf32> to vector<8x1xf32>
      %cst_97 = arith.constant 3.200000e+01 : f32
      %158 = vector.broadcast %cst_97 : f32 to vector<8x1xf32>
      %159 = arith.divf %157, %158 : vector<8x1xf32>
      %160 = vector.broadcast %152 : vector<8x1xf32> to vector<8x32xf32>
      %161 = arith.subf %146, %160 : vector<8x32xf32>
      %cst_98 = arith.constant 9.99999996E-13 : f32
      %162 = vector.broadcast %cst_98 : f32 to vector<8x1xf32>
      %163 = arith.addf %159, %162 : vector<8x1xf32>
      %164 = math.rsqrt %163 : vector<8x1xf32>
      %165 = vector.broadcast %164 : vector<8x1xf32> to vector<8x32xf32>
      %166 = arith.mulf %161, %165 : vector<8x32xf32>
      %167 = vector.broadcast %147 : vector<1x32xf32> to vector<8x32xf32>
      %168 = arith.mulf %166, %167 : vector<8x32xf32>
      %169 = vector.broadcast %148 : vector<1x32xf32> to vector<8x32xf32>
      %170 = arith.addf %168, %169 : vector<8x32xf32>
      %c0_99 = arith.constant 0 : index
      %c0_100 = arith.constant 0 : index
      %171 = vector.load %arg30[%c0_99, %c0_100] : memref<8x32xf32, #tpu.memory_space<vmem>>, vector<8x32xf32>
      tpu.vector_store %arg30[%c0_99, %c0_100], %170 {strides = array<i32>} : memref<8x32xf32, #tpu.memory_space<vmem>>, vector<8x32xf32>,
    } else {
    }
    %c0 = arith.constant 0 : index
    %c0_1 = arith.constant 0 : index
    %3 = vector.load %arg30[%c0, %c0_1] : memref<8x32xf32, #tpu.memory_space<vmem>>, vector<8x32xf32>
    %4 = arith.truncf %3 : vector<8x32xf32> to vector<8x32xbf16>
    %5 = vector.shape_cast %4 : vector<8x32xbf16> to vector<1x8x32xbf16>
    %6 = vector.broadcast %5 : vector<1x8x32xbf16> to vector<4x8x32xbf16>
    %c0_2 = arith.constant 0 : index
    %c0_3 = arith.constant 0 : index
    %c0_4 = arith.constant 0 : index
    %c0_5 = arith.constant 0 : index
    %7 = vector.load %arg6[%c0_2, %c0_3, %c0_4, %c0_5] : memref<1x4x32x8xbf16, #tpu.memory_space<vmem>>, vector<1x4x32x8xbf16>
    %8 = vector.shape_cast %7 : vector<1x4x32x8xbf16> to vector<4x32x8xbf16>
    "tpu.trace_start"() <{level = 10 : i32, message = "hli,hid->hld"}> : () -> ()
    %cst = arith.constant dense<0.000000e+00> : vector<4x8x8xf32>
    %9 = tpu.matmul %6, %8, %cst {dimension_numbers = #tpu.dot_dimension_numbers<[2], [1], [1], [2], [0, 0, 0, 1, 1, 2], [0], [0]>} : vector<4x8x32xbf16>, vector<4x32x8xbf16>, vector<4x8x8xf32> -> vector<4x8x8xf32>
    "tpu.trace_stop"() : () -> ()
    %c0_6 = arith.constant 0 : index
    %c0_7 = arith.constant 0 : index
    %c0_8 = arith.constant 0 : index
    %c0_9 = arith.constant 0 : index
    %10 = vector.load %arg7[%c0_6, %c0_7, %c0_8, %c0_9] : memref<1x4x1x8xf32, #tpu.memory_space<vmem>>, vector<1x4x1x8xf32>
    %11 = vector.shape_cast %10 : vector<1x4x1x8xf32> to vector<4x1x8xf32>
    %12 = vector.broadcast %11 : vector<4x1x8xf32> to vector<4x8x8xf32>
    %13 = arith.addf %9, %12 : vector<4x8x8xf32>
    %c0_10 = arith.constant 0 : index
    %c0_11 = arith.constant 0 : index
    %c0_12 = arith.constant 0 : index
    %c0_13 = arith.constant 0 : index
    %14 = vector.load %arg8[%c0_10, %c0_11, %c0_12, %c0_13] : memref<1x4x32x8xbf16, #tpu.memory_space<vmem>>, vector<1x4x32x8xbf16>
    %15 = vector.shape_cast %14 : vector<1x4x32x8xbf16> to vector<4x32x8xbf16>
    "tpu.trace_start"() <{level = 10 : i32, message = "hli,hid->hld"}> : () -> ()
    %cst_14 = arith.constant dense<0.000000e+00> : vector<4x8x8xf32>
    %16 = tpu.matmul %6, %15, %cst_14 {dimension_numbers = #tpu.dot_dimension_numbers<[2], [1], [1], [2], [0, 0, 0, 1, 1, 2], [0], [0]>} : vector<4x8x32xbf16>, vector<4x32x8xbf16>, vector<4x8x8xf32> -> vector<4x8x8xf32>
    "tpu.trace_stop"() : () -> ()
    %c0_15 = arith.constant 0 : index
    %c0_16 = arith.constant 0 : index
    %c0_17 = arith.constant 0 : index
    %c0_18 = arith.constant 0 : index
    %17 = vector.load %arg9[%c0_15, %c0_16, %c0_17, %c0_18] : memref<1x4x1x8xf32, #tpu.memory_space<vmem>>, vector<1x4x1x8xf32>
    %18 = vector.shape_cast %17 : vector<1x4x1x8xf32> to vector<4x1x8xf32>
    %19 = vector.broadcast %18 : vector<4x1x8xf32> to vector<4x8x8xf32>
    %20 = arith.addf %16, %19 : vector<4x8x8xf32>
    %c0_19 = arith.constant 0 : index
    %c0_20 = arith.constant 0 : index
    %c0_21 = arith.constant 0 : index
    %c0_22 = arith.constant 0 : index
    %21 = vector.load %arg10[%c0_19, %c0_20, %c0_21, %c0_22] : memref<1x4x32x8xbf16, #tpu.memory_space<vmem>>, vector<1x4x32x8xbf16>
    %22 = vector.shape_cast %21 : vector<1x4x32x8xbf16> to vector<4x32x8xbf16>
    "tpu.trace_start"() <{level = 10 : i32, message = "hli,hid->hld"}> : () -> ()
    %cst_23 = arith.constant dense<0.000000e+00> : vector<4x8x8xf32>
    %23 = tpu.matmul %6, %22, %cst_23 {dimension_numbers = #tpu.dot_dimension_numbers<[2], [1], [1], [2], [0, 0, 0, 1, 1, 2], [0], [0]>} : vector<4x8x32xbf16>, vector<4x32x8xbf16>, vector<4x8x8xf32> -> vector<4x8x8xf32>
    "tpu.trace_stop"() : () -> ()
    %c0_24 = arith.constant 0 : index
    %c0_25 = arith.constant 0 : index
    %c0_26 = arith.constant 0 : index
    %c0_27 = arith.constant 0 : index
    %24 = vector.load %arg11[%c0_24, %c0_25, %c0_26, %c0_27] : memref<1x4x1x8xf32, #tpu.memory_space<vmem>>, vector<1x4x1x8xf32>
    %25 = vector.shape_cast %24 : vector<1x4x1x8xf32> to vector<4x1x8xf32>
    %26 = vector.broadcast %25 : vector<4x1x8xf32> to vector<4x8x8xf32>
    %27 = arith.addf %23, %26 : vector<4x8x8xf32>
    %28 = arith.truncf %13 : vector<4x8x8xf32> to vector<4x8x8xbf16>
    %29 = arith.truncf %20 : vector<4x8x8xf32> to vector<4x8x8xbf16>
    "tpu.trace_start"() <{level = 10 : i32, message = "hqd,hkd->hqk"}> : () -> ()
    %cst_28 = arith.constant dense<0.000000e+00> : vector<4x8x8xf32>
    %30 = tpu.matmul %28, %29, %cst_28 {dimension_numbers = #tpu.dot_dimension_numbers<[2], [2], [1], [1], [0, 0, 0, 1, 1, 1], [0], [0]>} : vector<4x8x8xbf16>, vector<4x8x8xbf16>, vector<4x8x8xf32> -> vector<4x8x8xf32>
    "tpu.trace_stop"() : () -> ()
    %c0_29 = arith.constant 0 : index
    %c0_30 = arith.constant 0 : index
    %c0_31 = arith.constant 0 : index
    %31 = vector.load %arg3[%c0_29, %c0_30, %c0_31] : memref<1x1x8xf32, #tpu.memory_space<vmem>>, vector<1x1x8xf32>
    %32 = vector.shape_cast %31 : vector<1x1x8xf32> to vector<1x8xf32>
    %33 = vector.shape_cast %32 : vector<1x8xf32> to vector<1x1x8xf32>
    %34 = vector.broadcast %33 : vector<1x1x8xf32> to vector<4x8x8xf32>
    %35 = arith.addf %30, %34 : vector<4x8x8xf32>
    %cst_32 = arith.constant dense<0xFF800000> : vector<4x8xf32>
    %36 = vector.multi_reduction <maximumf>, %35, %cst_32 [2] : vector<4x8x8xf32> to vector<4x8xf32>
    %37 = vector.shape_cast %36 : vector<4x8xf32> to vector<4x8x1xf32>
    %38 = vector.broadcast %37 : vector<4x8x1xf32> to vector<4x8x8xf32>
    %39 = arith.subf %35, %38 : vector<4x8x8xf32>
    %40 = math.exp %39 : vector<4x8x8xf32>
    %cst_33 = arith.constant dense<0.000000e+00> : vector<4x8xf32>
    %41 = vector.multi_reduction <add>, %40, %cst_33 [2] : vector<4x8x8xf32> to vector<4x8xf32>
    %42 = vector.shape_cast %41 : vector<4x8xf32> to vector<4x8x1xf32>
    %43 = tpu.reciprocal %42 {approx = true} : vector<4x8x1xf32> -> vector<4x8x1xf32>
    %44 = vector.broadcast %43 : vector<4x8x1xf32> to vector<4x8x8xf32>
    %45 = arith.mulf %40, %44 : vector<4x8x8xf32>
    %46 = arith.truncf %45 : vector<4x8x8xf32> to vector<4x8x8xbf16>
    %47 = arith.truncf %27 : vector<4x8x8xf32> to vector<4x8x8xbf16>
    "tpu.trace_start"() <{level = 10 : i32, message = "hqk,hkd->hqd"}> : () -> ()
    %cst_34 = arith.constant dense<0.000000e+00> : vector<4x8x8xf32>
    %48 = tpu.matmul %46, %47, %cst_34 {dimension_numbers = #tpu.dot_dimension_numbers<[2], [1], [1], [2], [0, 0, 0, 1, 1, 2], [0], [0]>} : vector<4x8x8xbf16>, vector<4x8x8xbf16>, vector<4x8x8xf32> -> vector<4x8x8xf32>
    "tpu.trace_stop"() : () -> ()
    %49 = arith.truncf %48 : vector<4x8x8xf32> to vector<4x8x8xbf16>
    %c0_35 = arith.constant 0 : index
    %c0_36 = arith.constant 0 : index
    %c0_37 = arith.constant 0 : index
    %c0_38 = arith.constant 0 : index
    %50 = vector.load %arg12[%c0_35, %c0_36, %c0_37, %c0_38] : memref<1x4x8x32xbf16, #tpu.memory_space<vmem>>, vector<1x4x8x32xbf16>
    %51 = vector.shape_cast %50 : vector<1x4x8x32xbf16> to vector<4x8x32xbf16>
    "tpu.trace_start"() <{level = 10 : i32, message = "hqd,hdj->hqj"}> : () -> ()
    %cst_39 = arith.constant dense<0.000000e+00> : vector<4x8x32xf32>
    %52 = tpu.matmul %49, %51, %cst_39 {dimension_numbers = #tpu.dot_dimension_numbers<[2], [1], [1], [2], [0, 0, 0, 1, 1, 2], [0], [0]>} : vector<4x8x8xbf16>, vector<4x8x32xbf16>, vector<4x8x32xf32> -> vector<4x8x32xf32>
    "tpu.trace_stop"() : () -> ()
    %cst_40 = arith.constant dense<0.000000e+00> : vector<8x32xf32>
    %53 = vector.multi_reduction <add>, %52, %cst_40 [0] : vector<4x8x32xf32> to vector<8x32xf32>
    %c0_41 = arith.constant 0 : index
    %c0_42 = arith.constant 0 : index
    %c0_43 = arith.constant 0 : index
    %54 = vector.load %arg13[%c0_41, %c0_42, %c0_43] : memref<1x1x32xf32, #tpu.memory_space<vmem>>, vector<1x1x32xf32>
    %55 = vector.shape_cast %54 : vector<1x1x32xf32> to vector<1x32xf32>
    %56 = vector.broadcast %55 : vector<1x32xf32> to vector<8x32xf32>
    %57 = arith.addf %53, %56 : vector<8x32xf32>
    %58 = arith.addf %3, %57 : vector<8x32xf32>
    %c0_44 = arith.constant 0 : index
    %c0_45 = arith.constant 0 : index
    %c0_46 = arith.constant 0 : index
    %59 = vector.load %arg14[%c0_44, %c0_45, %c0_46] : memref<1x1x32xf32, #tpu.memory_space<vmem>>, vector<1x1x32xf32>
    %60 = vector.shape_cast %59 : vector<1x1x32xf32> to vector<1x32xf32>
    %c0_47 = arith.constant 0 : index
    %c0_48 = arith.constant 0 : index
    %c0_49 = arith.constant 0 : index
    %61 = vector.load %arg15[%c0_47, %c0_48, %c0_49] : memref<1x1x32xf32, #tpu.memory_space<vmem>>, vector<1x1x32xf32>
    %62 = vector.shape_cast %61 : vector<1x1x32xf32> to vector<1x32xf32>
    %cst_50 = arith.constant dense<0.000000e+00> : vector<8xf32>
    %63 = vector.multi_reduction <add>, %58, %cst_50 [1] : vector<8x32xf32> to vector<8xf32>
    %64 = vector.shape_cast %63 : vector<8xf32> to vector<8x1xf32>
    %cst_51 = arith.constant 3.200000e+01 : f32
    %65 = vector.broadcast %cst_51 : f32 to vector<8x1xf32>
    %66 = arith.divf %64, %65 : vector<8x1xf32>
    %67 = vector.broadcast %66 : vector<8x1xf32> to vector<8x32xf32>
    %68 = arith.subf %58, %67 : vector<8x32xf32>
    %69 = arith.mulf %68, %68 : vector<8x32xf32>
    %cst_52 = arith.constant dense<0.000000e+00> : vector<8xf32>
    %70 = vector.multi_reduction <add>, %69, %cst_52 [1] : vector<8x32xf32> to vector<8xf32>
    %71 = vector.shape_cast %70 : vector<8xf32> to vector<8x1xf32>
    %cst_53 = arith.constant 3.200000e+01 : f32
    %72 = vector.broadcast %cst_53 : f32 to vector<8x1xf32>
    %73 = arith.divf %71, %72 : vector<8x1xf32>
    %74 = vector.broadcast %66 : vector<8x1xf32> to vector<8x32xf32>
    %75 = arith.subf %58, %74 : vector<8x32xf32>
    %cst_54 = arith.constant 9.99999996E-13 : f32
    %76 = vector.broadcast %cst_54 : f32 to vector<8x1xf32>
    %77 = arith.addf %73, %76 : vector<8x1xf32>
    %78 = math.rsqrt %77 : vector<8x1xf32>
    %79 = vector.broadcast %78 : vector<8x1xf32> to vector<8x32xf32>
    %80 = arith.mulf %75, %79 : vector<8x32xf32>
    %81 = vector.broadcast %60 : vector<1x32xf32> to vector<8x32xf32>
    %82 = arith.mulf %80, %81 : vector<8x32xf32>
    %83 = vector.broadcast %62 : vector<1x32xf32> to vector<8x32xf32>
    %84 = arith.addf %82, %83 : vector<8x32xf32>
    %85 = arith.truncf %84 : vector<8x32xf32> to vector<8x32xbf16>
    %c0_55 = arith.constant 0 : index
    %c0_56 = arith.constant 0 : index
    %c0_57 = arith.constant 0 : index
    %86 = vector.load %arg16[%c0_55, %c0_56, %c0_57] : memref<1x32x64xbf16, #tpu.memory_space<vmem>>, vector<1x32x64xbf16>
    %87 = vector.shape_cast %86 : vector<1x32x64xbf16> to vector<32x64xbf16>
    %cst_58 = arith.constant dense<0.000000e+00> : vector<8x64xf32>
    %88 = tpu.matmul %85, %87, %cst_58 {dimension_numbers = #tpu.dot_dimension_numbers<[1], [0], [0], [1], [0, 0, 1, 1], [], []>} : vector<8x32xbf16>, vector<32x64xbf16>, vector<8x64xf32> -> vector<8x64xf32>
    %c0_59 = arith.constant 0 : index
    %c0_60 = arith.constant 0 : index
    %c0_61 = arith.constant 0 : index
    %89 = vector.load %arg17[%c0_59, %c0_60, %c0_61] : memref<1x1x64xf32, #tpu.memory_space<vmem>>, vector<1x1x64xf32>
    %90 = vector.shape_cast %89 : vector<1x1x64xf32> to vector<1x64xf32>
    %91 = vector.broadcast %90 : vector<1x64xf32> to vector<8x64xf32>
    %92 = arith.addf %88, %91 : vector<8x64xf32>
    %93 = arith.mulf %92, %92 : vector<8x64xf32>
    %94 = arith.mulf %92, %93 : vector<8x64xf32>
    %cst_62 = arith.constant 4.471500e-02 : f32
    %95 = vector.broadcast %cst_62 : f32 to vector<8x64xf32>
    %96 = arith.mulf %95, %94 : vector<8x64xf32>
    %97 = arith.addf %92, %96 : vector<8x64xf32>
    %cst_63 = arith.constant 0.797884583 : f32
    %98 = vector.broadcast %cst_63 : f32 to vector<8x64xf32>
    %99 = arith.mulf %98, %97 : vector<8x64xf32>
    %100 = math.tanh %99 : vector<8x64xf32>
    %cst_64 = arith.constant 1.000000e+00 : f32
    %101 = vector.broadcast %cst_64 : f32 to vector<8x64xf32>
    %102 = arith.addf %101, %100 : vector<8x64xf32>
    %cst_65 = arith.constant 5.000000e-01 : f32
    %103 = vector.broadcast %cst_65 : f32 to vector<8x64xf32>
    %104 = arith.mulf %103, %102 : vector<8x64xf32>
    %105 = arith.mulf %92, %104 : vector<8x64xf32>
    %106 = arith.truncf %105 : vector<8x64xf32> to vector<8x64xbf16>
    %c0_66 = arith.constant 0 : index
    %c0_67 = arith.constant 0 : index
    %c0_68 = arith.constant 0 : index
    %107 = vector.load %arg18[%c0_66, %c0_67, %c0_68] : memref<1x64x32xbf16, #tpu.memory_space<vmem>>, vector<1x64x32xbf16>
    %108 = vector.shape_cast %107 : vector<1x64x32xbf16> to vector<64x32xbf16>
    %cst_69 = arith.constant dense<0.000000e+00> : vector<8x32xf32>
    %109 = tpu.matmul %106, %108, %cst_69 {dimension_numbers = #tpu.dot_dimension_numbers<[1], [0], [0], [1], [0, 0, 1, 1], [], []>} : vector<8x64xbf16>, vector<64x32xbf16>, vector<8x32xf32> -> vector<8x32xf32>
    %c0_70 = arith.constant 0 : index
    %c0_71 = arith.constant 0 : index
    %c0_72 = arith.constant 0 : index
    %110 = vector.load %arg19[%c0_70, %c0_71, %c0_72] : memref<1x1x32xf32, #tpu.memory_space<vmem>>, vector<1x1x32xf32>
    %111 = vector.shape_cast %110 : vector<1x1x32xf32> to vector<1x32xf32>
    %112 = vector.broadcast %111 : vector<1x32xf32> to vector<8x32xf32>
    %113 = arith.addf %109, %112 : vector<8x32xf32>
    %114 = arith.addf %84, %113 : vector<8x32xf32>
    %c0_73 = arith.constant 0 : index
    %c0_74 = arith.constant 0 : index
    %c0_75 = arith.constant 0 : index
    %115 = vector.load %arg20[%c0_73, %c0_74, %c0_75] : memref<1x1x32xf32, #tpu.memory_space<vmem>>, vector<1x1x32xf32>
    %116 = vector.shape_cast %115 : vector<1x1x32xf32> to vector<1x32xf32>
    %c0_76 = arith.constant 0 : index
    %c0_77 = arith.constant 0 : index
    %c0_78 = arith.constant 0 : index
    %117 = vector.load %arg21[%c0_76, %c0_77, %c0_78] : memref<1x1x32xf32, #tpu.memory_space<vmem>>, vector<1x1x32xf32>
    %118 = vector.shape_cast %117 : vector<1x1x32xf32> to vector<1x32xf32>
    %cst_79 = arith.constant dense<0.000000e+00> : vector<8xf32>
    %119 = vector.multi_reduction <add>, %114, %cst_79 [1] : vector<8x32xf32> to vector<8xf32>
    %120 = vector.shape_cast %119 : vector<8xf32> to vector<8x1xf32>
    %cst_80 = arith.constant 3.200000e+01 : f32
    %121 = vector.broadcast %cst_80 : f32 to vector<8x1xf32>
    %122 = arith.divf %120, %121 : vector<8x1xf32>
    %123 = vector.broadcast %122 : vector<8x1xf32> to vector<8x32xf32>
    %124 = arith.subf %114, %123 : vector<8x32xf32>
    %125 = arith.mulf %124, %124 : vector<8x32xf32>
    %cst_81 = arith.constant dense<0.000000e+00> : vector<8xf32>
    %126 = vector.multi_reduction <add>, %125, %cst_81 [1] : vector<8x32xf32> to vector<8xf32>
    %127 = vector.shape_cast %126 : vector<8xf32> to vector<8x1xf32>
    %cst_82 = arith.constant 3.200000e+01 : f32
    %128 = vector.broadcast %cst_82 : f32 to vector<8x1xf32>
    %129 = arith.divf %127, %128 : vector<8x1xf32>
    %130 = vector.broadcast %122 : vector<8x1xf32> to vector<8x32xf32>
    %131 = arith.subf %114, %130 : vector<8x32xf32>
    %cst_83 = arith.constant 9.99999996E-13 : f32
    %132 = vector.broadcast %cst_83 : f32 to vector<8x1xf32>
    %133 = arith.addf %129, %132 : vector<8x1xf32>
    %134 = math.rsqrt %133 : vector<8x1xf32>
    %135 = vector.broadcast %134 : vector<8x1xf32> to vector<8x32xf32>
    %136 = arith.mulf %131, %135 : vector<8x32xf32>
    %137 = vector.broadcast %116 : vector<1x32xf32> to vector<8x32xf32>
    %138 = arith.mulf %136, %137 : vector<8x32xf32>
    %139 = vector.broadcast %118 : vector<1x32xf32> to vector<8x32xf32>
    %140 = arith.addf %138, %139 : vector<8x32xf32>
    %c0_84 = arith.constant 0 : index
    %c0_85 = arith.constant 0 : index
    %141 = vector.load %arg30[%c0_84, %c0_85] : memref<8x32xf32, #tpu.memory_space<vmem>>, vector<8x32xf32>
    tpu.vector_store %arg30[%c0_84, %c0_85], %140 {strides = array<i32>} : memref<8x32xf32, #tpu.memory_space<vmem>>, vector<8x32xf32>,
    %c1_i32 = arith.constant 1 : i32
    %142 = arith.cmpi eq, %arg1, %c1_i32 : i32
    %143 = arith.extui %142 : i1 to i32
    %c0_i32_86 = arith.constant 0 : i32
    %144 = arith.cmpi ne, %143, %c0_i32_86 : i32
    scf.if %144 {
      %145 = arith.truncf %140 : vector<8x32xf32> to vector<8x32xbf16>
      %c0_87 = arith.constant 0 : index
      %c0_88 = arith.constant 0 : index
      %146 = vector.load %arg24[%c0_87, %c0_88] : memref<32x128xbf16, #tpu.memory_space<vmem>>, vector<32x128xbf16>
      %cst_89 = arith.constant dense<0.000000e+00> : vector<8x128xf32>
      %147 = tpu.matmul %145, %146, %cst_89 {dimension_numbers = #tpu.dot_dimension_numbers<[1], [0], [0], [1], [0, 0, 1, 1], [], []>} : vector<8x32xbf16>, vector<32x128xbf16>, vector<8x128xf32> -> vector<8x128xf32>
      %c0_90 = arith.constant 0 : index
      %c0_91 = arith.constant 0 : index
      %148 = vector.load %arg25[%c0_90, %c0_91] : memref<1x128xf32, #tpu.memory_space<vmem>>, vector<1x128xf32>
      %149 = vector.broadcast %148 : vector<1x128xf32> to vector<8x128xf32>
      %150 = arith.addf %147, %149 : vector<8x128xf32>
      %c0_92 = arith.constant 0 : index
      %c0_93 = arith.constant 0 : index
      %c0_94 = arith.constant 0 : index
      %151 = vector.load %arg28[%c0_92, %c0_93, %c0_94] : memref<1x8x128xf32, #tpu.memory_space<vmem>>, vector<1x8x128xf32>
      %152 = vector.shape_cast %151 : vector<1x8x128xf32> to vector<8x128xf32>
      %153 = vector.shape_cast %150 : vector<8x128xf32> to vector<1x8x128xf32>
      tpu.vector_store %arg28[%c0_92, %c0_93, %c0_94], %153 {strides = array<i32>} : memref<1x8x128xf32, #tpu.memory_space<vmem>>, vector<1x8x128xf32>,
      %154 = vector.extract_strided_slice %145 {offsets = [0, 0], sizes = [1, 32], strides = [1, 1]} : vector<8x32xbf16> to vector<1x32xbf16>
      %c0_95 = arith.constant 0 : index
      %c0_96 = arith.constant 0 : index
      %155 = vector.load %arg22[%c0_95, %c0_96] : memref<32x32xbf16, #tpu.memory_space<vmem>>, vector<32x32xbf16>
      %cst_97 = arith.constant dense<0.000000e+00> : vector<1x32xf32>
      %156 = tpu.matmul %154, %155, %cst_97 {dimension_numbers = #tpu.dot_dimension_numbers<[1], [0], [0], [1], [0, 0, 1, 1], [], []>} : vector<1x32xbf16>, vector<32x32xbf16>, vector<1x32xf32> -> vector<1x32xf32>
      %c0_98 = arith.constant 0 : index
      %c0_99 = arith.constant 0 : index
      %157 = vector.load %arg23[%c0_98, %c0_99] : memref<1x32xf32, #tpu.memory_space<vmem>>, vector<1x32xf32>
      %158 = arith.addf %156, %157 : vector<1x32xf32>
      %159 = math.tanh %158 : vector<1x32xf32>
      %160 = arith.truncf %159 : vector<1x32xf32> to vector<1x32xbf16>
      %c0_100 = arith.constant 0 : index
      %c0_101 = arith.constant 0 : index
      %161 = vector.load %arg26[%c0_100, %c0_101] : memref<32x128xbf16, #tpu.memory_space<vmem>>, vector<32x128xbf16>
      %cst_102 = arith.constant dense<0.000000e+00> : vector<1x128xf32>
      %162 = tpu.matmul %160, %161, %cst_102 {dimension_numbers = #tpu.dot_dimension_numbers<[1], [0], [0], [1], [0, 0, 1, 1], [], []>} : vector<1x32xbf16>, vector<32x128xbf16>, vector<1x128xf32> -> vector<1x128xf32>
      %c0_103 = arith.constant 0 : index
      %c0_104 = arith.constant 0 : index
      %163 = vector.load %arg27[%c0_103, %c0_104] : memref<1x128xf32, #tpu.memory_space<vmem>>, vector<1x128xf32>
      %164 = arith.addf %162, %163 : vector<1x128xf32>
      %c0_105 = arith.constant 0 : index
      %c0_106 = arith.constant 0 : index
      %c0_107 = arith.constant 0 : index
      %165 = vector.load %arg29[%c0_105, %c0_106, %c0_107] : memref<1x1x128xf32, #tpu.memory_space<vmem>>, vector<1x1x128xf32>
      %166 = vector.shape_cast %165 : vector<1x1x128xf32> to vector<1x128xf32>
      %167 = vector.shape_cast %164 : vector<1x128xf32> to vector<1x1x128xf32>
      tpu.vector_store %arg29[%c0_105, %c0_106, %c0_107], %167 {strides = array<i32>} : memref<1x1x128xf32, #tpu.memory_space<vmem>>, vector<1x1x128xf32>,
    } else {
    }
    return
  }
  func.func @transform_0(%arg0: i32, %arg1: i32) -> (i32, i32, i32) {
    %c0_i32 = arith.constant 0 : i32
    %c0_i32_0 = arith.constant 0 : i32
    %c0_i32_1 = arith.constant 0 : i32
    return %arg0, %c0_i32, %c0_i32_0 : i32, i32, i32
  }
  func.func @transform_1(%arg0: i32, %arg1: i32) -> (i32, i32, i32) {
    %c0_i32 = arith.constant 0 : i32
    %c0_i32_0 = arith.constant 0 : i32
    %c0_i32_1 = arith.constant 0 : i32
    return %arg0, %c0_i32, %c0_i32_0 : i32, i32, i32
  }
  func.func @transform_2(%arg0: i32, %arg1: i32) -> (i32, i32) {
    %c0_i32 = arith.constant 0 : i32
    %c0_i32_0 = arith.constant 0 : i32
    %c0_i32_1 = arith.constant 0 : i32
    return %c0_i32, %c0_i32_0 : i32, i32
  }
  func.func @transform_3(%arg0: i32, %arg1: i32) -> (i32, i32) {
    %c0_i32 = arith.constant 0 : i32
    %c0_i32_0 = arith.constant 0 : i32
    %c0_i32_1 = arith.constant 0 : i32
    return %c0_i32, %c0_i32_0 : i32, i32
  }
  func.func @transform_4(%arg0: i32, %arg1: i32) -> (i32, i32, i32, i32) {
    %c0_i32 = arith.constant 0 : i32
    %c0_i32_0 = arith.constant 0 : i32
    %c0_i32_1 = arith.constant 0 : i32
    %c0_i32_2 = arith.constant 0 : i32
    return %arg1, %c0_i32, %c0_i32_0, %c0_i32_1 : i32, i32, i32, i32
  }
  func.func @transform_5(%arg0: i32, %arg1: i32) -> (i32, i32, i32, i32) {
    %c0_i32 = arith.constant 0 : i32
    %c0_i32_0 = arith.constant 0 : i32
    %c0_i32_1 = arith.constant 0 : i32
    %c0_i32_2 = arith.constant 0 : i32
    return %arg1, %c0_i32, %c0_i32_0, %c0_i32_1 : i32, i32, i32, i32
  }
  func.func @transform_6(%arg0: i32, %arg1: i32) -> (i32, i32, i32, i32) {
    %c0_i32 = arith.constant 0 : i32
    %c0_i32_0 = arith.constant 0 : i32
    %c0_i32_1 = arith.constant 0 : i32
    %c0_i32_2 = arith.constant 0 : i32
    return %arg1, %c0_i32, %c0_i32_0, %c0_i32_1 : i32, i32, i32, i32
  }
  func.func @transform_7(%arg0: i32, %arg1: i32) -> (i32, i32, i32, i32) {
    %c0_i32 = arith.constant 0 : i32
    %c0_i32_0 = arith.constant 0 : i32
    %c0_i32_1 = arith.constant 0 : i32
    %c0_i32_2 = arith.constant 0 : i32
    return %arg1, %c0_i32, %c0_i32_0, %c0_i32_1 : i32, i32, i32, i32
  }
  func.func @transform_8(%arg0: i32, %arg1: i32) -> (i32, i32, i32, i32) {
    %c0_i32 = arith.constant 0 : i32
    %c0_i32_0 = arith.constant 0 : i32
    %c0_i32_1 = arith.constant 0 : i32
    %c0_i32_2 = arith.constant 0 : i32
    return %arg1, %c0_i32, %c0_i32_0, %c0_i32_1 : i32, i32, i32, i32
  }
  func.func @transform_9(%arg0: i32, %arg1: i32) -> (i32, i32, i32, i32) {
    %c0_i32 = arith.constant 0 : i32
    %c0_i32_0 = arith.constant 0 : i32
    %c0_i32_1 = arith.constant 0 : i32
    %c0_i32_2 = arith.constant 0 : i32
    return %arg1, %c0_i32, %c0_i32_0, %c0_i32_1 : i32, i32, i32, i32
  }
  func.func @transform_10(%arg0: i32, %arg1: i32) -> (i32, i32, i32, i32) {
    %c0_i32 = arith.constant 0 : i32
    %c0_i32_0 = arith.constant 0 : i32
    %c0_i32_1 = arith.constant 0 : i32
    %c0_i32_2 = arith.constant 0 : i32
    return %arg1, %c0_i32, %c0_i32_0, %c0_i32_1 : i32, i32, i32, i32
  }
  func.func @transform_11(%arg0: i32, %arg1: i32) -> (i32, i32, i32) {
    %c0_i32 = arith.constant 0 : i32
    %c0_i32_0 = arith.constant 0 : i32
    %c0_i32_1 = arith.constant 0 : i32
    return %arg1, %c0_i32, %c0_i32_0 : i32, i32, i32
  }
  func.func @transform_12(%arg0: i32, %arg1: i32) -> (i32, i32, i32) {
    %c0_i32 = arith.constant 0 : i32
    %c0_i32_0 = arith.constant 0 : i32
    %c0_i32_1 = arith.constant 0 : i32
    return %arg1, %c0_i32, %c0_i32_0 : i32, i32, i32
  }
  func.func @transform_13(%arg0: i32, %arg1: i32) -> (i32, i32, i32) {
    %c0_i32 = arith.constant 0 : i32
    %c0_i32_0 = arith.constant 0 : i32
    %c0_i32_1 = arith.constant 0 : i32
    return %arg1, %c0_i32, %c0_i32_0 : i32, i32, i32
  }
  func.func @transform_14(%arg0: i32, %arg1: i32) -> (i32, i32, i32) {
    %c0_i32 = arith.constant 0 : i32
    %c0_i32_0 = arith.constant 0 : i32
    %c0_i32_1 = arith.constant 0 : i32
    return %arg1, %c0_i32, %c0_i32_0 : i32, i32, i32
  }
  func.func @transform_15(%arg0: i32, %arg1: i32) -> (i32, i32, i32) {
    %c0_i32 = arith.constant 0 : i32
    %c0_i32_0 = arith.constant 0 : i32
    %c0_i32_1 = arith.constant 0 : i32
    return %arg1, %c0_i32, %c0_i32_0 : i32, i32, i32
  }
  func.func @transform_16(%arg0: i32, %arg1: i32) -> (i32, i32, i32) {
    %c0_i32 = arith.constant 0 : i32
    %c0_i32_0 = arith.constant 0 : i32
    %c0_i32_1 = arith.constant 0 : i32
    return %arg1, %c0_i32, %c0_i32_0 : i32, i32, i32
  }
  func.func @transform_17(%arg0: i32, %arg1: i32) -> (i32, i32, i32) {
    %c0_i32 = arith.constant 0 : i32
    %c0_i32_0 = arith.constant 0 : i32
    %c0_i32_1 = arith.constant 0 : i32
    return %arg1, %c0_i32, %c0_i32_0 : i32, i32, i32
  }
  func.func @transform_18(%arg0: i32, %arg1: i32) -> (i32, i32, i32) {
    %c0_i32 = arith.constant 0 : i32
    %c0_i32_0 = arith.constant 0 : i32
    %c0_i32_1 = arith.constant 0 : i32
    return %arg1, %c0_i32, %c0_i32_0 : i32, i32, i32
  }
  func.func @transform_19(%arg0: i32, %arg1: i32) -> (i32, i32, i32) {
    %c0_i32 = arith.constant 0 : i32
    %c0_i32_0 = arith.constant 0 : i32
    %c0_i32_1 = arith.constant 0 : i32
    return %arg1, %c0_i32, %c0_i32_0 : i32, i32, i32
  }
  func.func @transform_20(%arg0: i32, %arg1: i32) -> (i32, i32) {
    %c0_i32 = arith.constant 0 : i32
    %c0_i32_0 = arith.constant 0 : i32
    %c0_i32_1 = arith.constant 0 : i32
    return %c0_i32, %c0_i32_0 : i32, i32
  }
  func.func @transform_21(%arg0: i32, %arg1: i32) -> (i32, i32) {
    %c0_i32 = arith.constant 0 : i32
    %c0_i32_0 = arith.constant 0 : i32
    %c0_i32_1 = arith.constant 0 : i32
    return %c0_i32, %c0_i32_0 : i32, i32
  }
  func.func @transform_22(%arg0: i32, %arg1: i32) -> (i32, i32) {
    %c0_i32 = arith.constant 0 : i32
    %c0_i32_0 = arith.constant 0 : i32
    %c0_i32_1 = arith.constant 0 : i32
    return %c0_i32, %c0_i32_0 : i32, i32
  }
  func.func @transform_23(%arg0: i32, %arg1: i32) -> (i32, i32) {
    %c0_i32 = arith.constant 0 : i32
    %c0_i32_0 = arith.constant 0 : i32
    %c0_i32_1 = arith.constant 0 : i32
    return %c0_i32, %c0_i32_0 : i32, i32
  }
  func.func @transform_24(%arg0: i32, %arg1: i32) -> (i32, i32) {
    %c0_i32 = arith.constant 0 : i32
    %c0_i32_0 = arith.constant 0 : i32
    %c0_i32_1 = arith.constant 0 : i32
    return %c0_i32, %c0_i32_0 : i32, i32
  }
  func.func @transform_25(%arg0: i32, %arg1: i32) -> (i32, i32) {
    %c0_i32 = arith.constant 0 : i32
    %c0_i32_0 = arith.constant 0 : i32
    %c0_i32_1 = arith.constant 0 : i32
    return %c0_i32, %c0_i32_0 : i32, i32
  }
  func.func @transform_26(%arg0: i32, %arg1: i32) -> (i32, i32, i32) {
    %c0_i32 = arith.constant 0 : i32
    %c0_i32_0 = arith.constant 0 : i32
    %c0_i32_1 = arith.constant 0 : i32
    return %arg0, %c0_i32, %c0_i32_0 : i32, i32, i32
  }
  func.func @transform_27(%arg0: i32, %arg1: i32) -> (i32, i32, i32) {
    %c0_i32 = arith.constant 0 : i32
    %c0_i32_0 = arith.constant 0 : i32
    %c0_i32_1 = arith.constant 0 : i32
    return %arg0, %c0_i32, %c0_i32_0 : i32, i32, i32
  }
}

</mosaic_0001>

<bundles_post_ra>
// kernel: bert_slu_forward.1
= control target key start
LH: loop header
LB: loop body
LE: loop exit
PB: predicated region body
PF: predicated region fallthrough
CT: control target
= control target key end

     0   :  { %s3470_s0 = inlined_call_operand.vmem [shape: f32[2,8,32], index: 0, kind: input, shape index: {}]   ;;  %s3471_s1 = inlined_call_operand.vmem [shape: f32[2,1,8], index: 1, kind: input, shape index: {}]   ;;  %s3472_s2 = inlined_call_operand.vmem [shape: f32[1,32], index: 2, kind: input, shape index: {}]   ;;  %s3473_s3 = inlined_call_operand.vmem [shape: f32[1,32], index: 3, kind: input, shape index: {}]   ;;  %s3474_s4 = inlined_call_operand.vmem [shape: bf16[2,4,32,8], index: 4, kind: input, shape index: {}]   ;;  %s3475_s5 = inlined_call_operand.vmem [shape: f32[2,4,1,8], index: 5, kind: input, shape index: {}]   ;;  %s3476_s6 = inlined_call_operand.vmem [shape: bf16[2,4,32,8], index: 6, kind: input, shape index: {}]   ;;  %s3477_s7 = inlined_call_operand.vmem [shape: f32[2,4,1,8], index: 7, kind: input, shape index: {}]   ;;  %s3478_s8 = inlined_call_operand.vmem [shape: bf16[2,4,32,8], index: 8, kind: input, shape index: {}]   ;;  %s3479_s9 = inlined_call_operand.vmem [shape: f32[2,4,1,8], index: 9, kind: input, shape index: {}]   ;;  %s3480_s10 = inlined_call_operand.vmem [shape: bf16[2,4,8,32], index: 10, kind: input, shape index: {}]   ;;  %s3481_s11 = inlined_call_operand.vmem [shape: f32[2,1,32], index: 11, kind: input, shape index: {}]   ;;  %s3482_s12 = inlined_call_operand.vmem [shape: f32[2,1,32], index: 12, kind: input, shape index: {}]   ;;  %s3483_s13 = inlined_call_operand.vmem [shape: f32[2,1,32], index: 13, kind: input, shape index: {}]   ;;  %s3484_s14 = inlined_call_operand.vmem [shape: bf16[2,32,64], index: 14, kind: input, shape index: {}]   ;;  %s3485_s15 = inlined_call_operand.vmem [shape: f32[2,1,64], index: 15, kind: input, shape index: {}]   ;;  %s3486_s16 = inlined_call_operand.vmem [shape: bf16[2,64,32], index: 16, kind: input, shape index: {}]   ;;  %s3487_s17 = inlined_call_operand.vmem [shape: f32[2,1,32], index: 17, kind: input, shape index: {}]   ;;  %s3488_s18 = inlined_call_operand.vmem [shape: f32[2,1,32], index: 18, kind: input, shape index: {}]   ;;  %s3489_s19 = inlined_call_operand.vmem [shape: f32[2,1,32], index: 19, kind: input, shape index: {}]   ;;  %s3490_s20 = inlined_call_operand.vmem [shape: bf16[32,32], index: 20, kind: input, shape index: {}]   ;;  %s3491_s21 = inlined_call_operand.vmem [shape: f32[1,32], index: 21, kind: input, shape index: {}]   ;;  %s3492_s22 = inlined_call_operand.vmem [shape: bf16[32,128], index: 22, kind: input, shape index: {}]   ;;  %s3493_s23 = inlined_call_operand.vmem [shape: f32[1,128], index: 23, kind: input, shape index: {}]   ;;  %s3494_s24 = inlined_call_operand.vmem [shape: bf16[32,128], index: 24, kind: input, shape index: {}]   ;;  %s3495_s25 = inlined_call_operand.vmem [shape: f32[1,128], index: 25, kind: input, shape index: {}]   ;;  %s3496_s26 = inlined_call_operand.vmem [shape: f32[2,8,128], index: 26, kind: output, shape index: {0}]   ;;  %s3497_s27 = inlined_call_operand.hbm [shape: f32[2,1,128], index: 27, kind: output, shape index: {1}]  }
   0x1   :  { %3520 = sst [smem:[#allocation24_spill]] %s3470_s0 }
   0x2   :  { %3521 = sst [smem:[#allocation25_spill]] %s3471_s1 }
   0x3   :  { %3522 = sst [smem:[#allocation26_spill]] %s3472_s2 }
   0x4   :  { %3523 = sst [smem:[#allocation27_spill]] %s3473_s3 }
   0x5   :  { %3524 = sst [smem:[#allocation28_spill]] %s3474_s4 }
   0x6   :  { %3525 = sst [smem:[#allocation29_spill]] %s3475_s5 }
   0x7   :  { %3526 = sst [smem:[#allocation30_spill]] %s3476_s6 }
   0x8   :  { %3527 = sst [smem:[#allocation31_spill]] %s3477_s7 }
   0x9   :  { %3528 = sst [smem:[#allocation32_spill]] %s3478_s8 }
   0xa   :  { %3529 = sst [smem:[#allocation33_spill]] %s3479_s9 }
   0xb   :  { %3530 = sst [smem:[#allocation34_spill]] %s3480_s10 }
   0xc   :  { %3531 = sst [smem:[#allocation35_spill]] %s3481_s11 }
   0xd   :  { %3532 = sst [smem:[#allocation36_spill]] %s3484_s14 }
   0xe   :  { %3533 = sst [smem:[#allocation37_spill]] %s3489_s19 }
   0xf   :  { %3534 = sst [smem:[#allocation38_spill]] %s3490_s20 }
  0x10   :  { %3535 = sst [smem:[#allocation39_spill]] %s3491_s21 }
  0x11   :  { %3536 = sst [smem:[#allocation40_spill]] %s3492_s22 }
  0x12   :  { %3537 = sst [smem:[#allocation41_spill]] %s3493_s23 }
  0x13   :  { %3538 = sst [smem:[#allocation42_spill]] %s3494_s24 }
  0x14   :  { %3539 = sst [smem:[#allocation43_spill]] %s3495_s25 }
  0x15   :  { %3540 = sst [smem:[#allocation44_spill]] %s3496_s26 }
  0x16   :  { %3541 = sst [smem:[#allocation45_spill]] %s3497_s27 }
  0x17   :  { %33 = vsyncpa [#allocation4], 0 }
  0x18   :  { %35 = vsyncpa [#allocation4 + $0x1], 0  ;;  %s3059_s7 = smov 0   ;;  %s3061_s4 = smov 0  }
  0x19   :  { %s3063_s8 = smov 0   ;;  %s3065_s30 = smov 0  }
  0x1a   :  { %s3067_s9 = smov 0   ;;  %s3069_s5 = smov 0  }
  0x1b   :  { %s3071_s28 = smov 0   ;;  %s3073_s0 = smov 0  }
  0x1c LB: > { %3542 = sst [smem:[#allocation6_spill]] %s2887_s7  ;;  %s2454_s10 = sadd.s32 4294967295, %s2915_s0   ;;  %s2915_s0 = sphi %s3073_s0, %s41_s0   ;;  %s2911_s28 = sphi %s3071_s28, %s3613_s28   ;;  %s2907_s5 = sphi %s3069_s5, %s3612_s5   ;;  %s2903_s9 = sphi %s3067_s9, %s3611_s9   ;;  %s2899_s30 = sphi %s3065_s30, %s3610_s30   ;;  %s2895_s8 = sphi %s3063_s8, %s3616_s8   ;;  %s2891_s4 = sphi %s3061_s4, %s3615_s4   ;;  %s2887_s7 = sphi %s3059_s7, %s3614_s7  }
  0x1d   : > { %3543 = sst [smem:[#allocation7_spill]] %s2895_s8  ;;  %s2455_s29 = sadd.s32 4294967294, %s2915_s0  }
  0x1e   : > { %3544 = sst [smem:[#allocation8_spill]] %s2899_s30  ;;  %s50_s1 = sadd.s32 1, %s2907_s5 }
  0x1f   : > { %3545 = sst [smem:[#allocation9_spill]] %s2903_s9  ;;  %p51_p0 = scmp.ge.s32.totalorder %s50_s1, 2 }
  0x20   : > { %3546 = sst [smem:[#allocation10_spill]] %s2907_s5  ;;  %s53_s6 = sadd.s32 1, %s2911_s28 }
  0x21   : > { %3547 = sst [smem:[#allocation11_spill]] %s2911_s28  ;;  %p732_p1 = scmp.ne.s32.totalorder %s2895_s8, %s2891_s4 }
  0x22   : > { %3548 = sst [smem:[#allocation12_spill]] %s2915_s0  ;;  %p733_p2 = scmp.eq.s32.totalorder %s2454_s10, 3 }
  0x23   : > { %s3618_s1 = smov (%p51_p0, %s50_s1), 0  ;;  %s3620_s6 = smov (!%p51_p0, %s53_s6), %s2911_s28 }
  0x24   : > { %3549 = sst [smem:[#allocation13_spill]] %s3618_s1  ;;  %p3108_p3 = por %p733_p2, %p732_p1 }
  0x25   : > { %p738_p4 = scmp.ne.s32.totalorder %s2891_s4, %s2887_s7  ;;  %p55_p5 = scmp.ge.s32.totalorder %s3620_s6, 2 }
  0x26   : > { %s3550_s11 = scalar_select %p3108_p3, 1, 0 }
  0x27   : > { %p739_p6 = scmp.eq.s32.totalorder %s2455_s29, 3  ;;  %p2458_p7 = scmp.ge.s32.totalorder %s2915_s0, 1 }
  0x28   : > { %3551 = sst [smem:[#allocation14_spill]] %s3550_s11  ;;  %p905_p8 = scmp.lt.s32.totalorder %s2915_s0, 5 }
  0x29   : > { %s3622_s6 = smov (%p55_p5, %s3620_s6), 0  ;;  %p3118_p9 = por %p739_p6, %p738_p4 }
  0x2a   : > { %3552 = sst [smem:[#allocation15_spill]] %s3622_s6  ;;  %p906_p10 = pnand %p2458_p7, %p905_p8 }
  0x2b   : > { %s3553_s2 = scalar_select %p3118_p9, 1, 0 }
  0x2c   : > { %s719_s3 = ssub.s32 %s2911_s28, %s3622_s6  ;;  %s722_s10 = sadd.s32 1, %s2895_s8 }
  0x2d   : > { %3554 = sst [smem:[#allocation16_spill]] %s3553_s2  ;;  %p720_p11 = scmp.eq.s32.totalorder %s719_s3, 0 }
  0x2e   : > { %909 = sbr.rel (%p906_p10) target bundleno = 2329 (0x919), region = 124 }
  0x2f   : > { %s3126_s1 = scalar_select %p720_p11, %s2895_s8, %s722_s10  }
  0x31   : > { %3555 = sst [smem:[#allocation17_spill]] %s3126_s1 }
  0x33   : > { %p1045_p12 = scmp.lt.s32.totalorder %s2903_s9, 1  ;;  %p1052_p13 = scmp.lt.s32.totalorder %s2899_s30, 1 }
  0x34   : > { %s3558_s7 = sld [smem:[#allocation24_spill]]  ;;  %s3575_s1 = sand.u32 1, %s2891_s4  }
  0x35   : > { %s3132_s5 = scalar_select %p1045_p12, %s2903_s9, 1 }
  0x36   : > { %s3135_s2 = scalar_select %p1052_p13, %s2899_s30, 1 }
  0x37   : > { %3556 = sst [smem:[#allocation18_spill]] %s3132_s5  ;;  %s2459_s3 = sshll.u32 %s3132_s5, 3 }
  0x38   : > { %s2653_s11 = sshll.u32 %s3135_s2, 6  ;;  %s3559_s25 = sld [smem:[#allocation28_spill]] }
  0x39   : > { %s2462_s21 = sshll.u32 %s3135_s2, 2  ;;  %s3561_s20 = sld [smem:[#allocation29_spill]] }
  0x3a   : > { %s1048_s0 = scalar_lea.vmem %s3558_s7, %s2459_s3  ;;  %s3563_s8 = sld [smem:[#allocation30_spill]] }
  0x3b   : > { %s3565_s5 = sld [smem:[#allocation31_spill]]  ;;  %s2656_s28 = sshll.u32 %s3135_s2, 4 }
  0x3c   : > { %s3568_s24 = sld [smem:[#allocation33_spill]] }
  0x3d   : > { %s3572_s14 = sld [smem:[#allocation36_spill]] }
  0x3e   : > { %s3149_s23 = scalar_lea.vmem %s3559_s25, %s2653_s11  ;;  %s3573_s22 = sld [smem:[#allocation37_spill]] }
  0x3f   : > { %3560 = sst [smem:[#allocation19_spill]] %s3149_s23  ;;  %s3155_s6 = scalar_lea.vmem %s3561_s20, %s2462_s21 }
  0x40   : > { %3562 = sst [smem:[#allocation20_spill]] %s3155_s6  ;;  %s3160_s7 = scalar_lea.vmem %s3563_s8, %s2653_s11 }
  0x41   : > { %3564 = sst [smem:[#allocation21_spill]] %s3160_s7  ;;  %s3165_s27 = scalar_lea.vmem %s3565_s5, %s2462_s21 }
  0x42   : > { %3566 = sst [smem:[#allocation22_spill]] %s3165_s27  ;;  %s3175_s6 = scalar_lea.vmem %s3568_s24, %s2462_s21 }
  0x43   : > { %s3567_s23 = sld [smem:[#allocation32_spill]]  ;;  %s3198_s24 = scalar_lea.vmem %s3572_s14, %s2656_s28 }
  0x44   : > { %s3569_s7 = sld [smem:[#allocation34_spill]]  ;;  %s1111_s21 = scalar_lea.vmem %s3488_s18, %s3135_s2 }
  0x45   : > { %s1114_s27 = scalar_lea.vmem %s3573_s22, %s3135_s2  ;;  %s3574_s8 = sld [smem:[#allocation44_spill]] }
  0x46   : > { %s3229_s5 = scalar_lea.vmem [#allocation3], %s3575_s1  ;;  %s3576_s29 = sld [smem:[#allocation8_spill]] }
  0x49   : > { %s3170_s30 = scalar_lea.vmem %s3567_s23, %s2653_s11 }
  0x4a   : > { %s3181_s26 = scalar_lea.vmem %s3569_s7, %s2656_s28 }
  0x4b   : > { %3570 = sst [smem:[#allocation23_spill]] %s3181_s26  ;;  %s2658_s26 = sshll.u32 %s3135_s2, 5 }
  0x4c   : > { %s3212_s23 = scalar_lea.vmem %s3486_s16, %s2658_s26  ;;  %s3225_s14 = scalar_lea.vmem %s3574_s8, %s2459_s3 }
  0x4d   : > { %p2476_p0 = scmp.ne.s32.totalorder %s3576_s29, 0 }
  0x4e   : > { %s3577_s3 = sld [smem:[#allocation26_spill]] (!%p2476_p0) }
  0x4f   : > { %1123 = sbr.rel (%p2476_p0) target bundleno = 354 (0x162), region = 128  ;;  %s3578_s29 = sld [smem:[#allocation27_spill]] (!%p2476_p0) }
  0x54   : > { %v1124_v0 = vld [vmem:[%s1048_s0] sm:$0xff]  ;;  %vm1127_vm0 = vcmask 261120   ;;  %v2917_v2 = vmov 32.0  }
  0x55   : > { %v1128_v1 = vsel %vm1127_vm0, %v1124_v0, 0.0  ;;  %2770 = vrcp.f32 %v2917_v2  ;;  %v2768_v23 = vld [vmem:[%s3577_s3] ss:$0 sm:$0xff] }
  0x56   : > { %1129 = vadd.xlane.f32.xlu0 %v1128_v1  ;;  %v2769_v25 = vld [vmem:[%s3578_s29] ss:$0 sm:$0xff] }
  0x5b   : > { %v2771_v3 = vpop.eup %2770 }
  0x5c   : > { %v1132_v4 = vmul.f32 32.0, %v2771_v3  ;;  %vm1136_vm1 = vweird.f32 %v2771_v3 }
  0x5e   : > { %v1133_v5 = vsub.f32 1.0, %v1132_v4 }
  0x60   : > { %v1134_v6 = vmul.f32 %v2771_v3, %v1133_v5 }
  0x62   : > { %v1135_v7 = vadd.f32 %v2771_v3, %v1134_v6 }
  0x64   : > { %v1137_v8 = vsel %vm1136_vm1, %v2771_v3, %v1135_v7 }
  0xc9   : > { %v1130_v9 = vpop.xlane.xlu0 %1129 }
  0xca   : > { %v1138_v10 = vmul.f32 %v1137_v8, %v1130_v9 }
  0xcc   : > { %v1139_v11 = vsub.f32 %v1124_v0, %v1138_v10 }
  0xce   : > { %v1140_v12 = vmul.f32 %v1139_v11, %v1139_v11 }
  0xd0   : > { %v1141_v13 = vsel %vm1127_vm0, %v1140_v12, 0.0 }
  0xd1   : > { %1142 = vadd.xlane.f32.xlu0 %v1141_v13 }
 0x144   : > { %v1143_v14 = vpop.xlane.xlu0 %1142 }
 0x145   : > { %v1144_v15 = vmul.f32 %v1143_v14, %v1137_v8 }
 0x147   : > { %v1145_v16 = vadd.f32 1e-12, %v1144_v15 }
 0x149   : > { %2772 = vrsqrt.f32 %v1145_v16  ;;  %vm1152_vm3 = vweird.f32 %v1145_v16 }
 0x14f   : > { %v2773_v17 = vpop.eup %2772 }
 0x150   : > { %v1147_v18 = vmul.f32 %v2773_v17, %v1145_v16  ;;  %vm1153_vm2 = vweird.f32 %v2773_v17 }
 0x151   : > { %vm1154_vm4 = vmor %vm1152_vm3, %vm1153_vm2 }
 0x152   : > { %v1148_v19 = vmul.f32 %v2773_v17, %v1147_v18 }
 0x154   : > { %v1149_v20 = vmul.f32 0.5, %v1148_v19 }
 0x156   : > { %v1150_v21 = vsub.f32 1.5, %v1149_v20 }
 0x158   : > { %v1151_v22 = vmul.f32 %v2773_v17, %v1150_v21 }
 0x15a   : > { %v1155_v24 = vsel %vm1154_vm4, %v2773_v17, %v1151_v22 }
 0x15b   : > { %v1156_v26 = vmul.f32 %v1155_v24, %v1139_v11 }
 0x15d   : > { %v1160_v27 = vmul.f32 %v2768_v23, %v1156_v26 }
 0x15f   : > { %v1164_v28 = vadd.f32 %v2769_v25, %v1160_v27 }
 0x161   : > { %1165 = vst.msk [vmem:[#allocation2] sm:$0xff] %vm1127_vm0, %v1164_v28 }
 0x162 PF: > { %s3579_s19 = sld [smem:[#allocation19_spill]]  ;;  %vm1212_vm5 = vcmask 261120   ;;  %v2680_v47 = vld [vmem:[%s3170_s30 + $0x28] sm:$0xff]  ;;  %v2678_v49 = vld [vmem:[%s3170_s30 + $0x18] sm:$0xff]  ;;  %v2679_v50 = vld [vmem:[%s3170_s30 + $0x20] sm:$0xff]  ;;  %vm1580_vm6 = vcmask 64512   ;;  %s3589_s8 = scalar_lea.vmem %s3482_s12, %s3135_s2 }
 0x163   : > { %s3580_s25 = sld [smem:[#allocation21_spill]]  ;;  %v2676_v48 = vld [vmem:[%s3170_s30 + $0x8] sm:$0xff]  ;;  %v2675_v51 = vld [vmem:[%s3170_s30] sm:$0xff]  ;;  %v2677_v52 = vld [vmem:[%s3170_s30 + $0x10] sm:$0xff]  ;;  %vm1712_vm7 = vcmask 1043456   ;;  %vm2005_vm12 = vcmask 523264   ;;  %s3592_s20 = scalar_lea.vmem %s3487_s17, %s3135_s2 }
 0x164   : > { %v2682_v53 = vld [vmem:[%s3170_s30 + $0x38] sm:$0xff]  ;;  %s3581_s11 = sld [smem:[#allocation22_spill]]  ;;  %v2681_v54 = vld [vmem:[%s3170_s30 + $0x30] sm:$0xff] }
 0x165   : > { %s3582_s9 = sld [smem:[#allocation20_spill]] }
 0x166   : > { %s3583_s30 = sld [smem:[#allocation18_spill]] }
 0x167   : > { %s3584_s10 = sld [smem:[#allocation25_spill]] }
 0x168   : > { %v2660_v29 = vld [vmem:[%s3579_s19 + $0x8] sm:$0xff]  ;;  %v2662_v30 = vld [vmem:[%s3579_s19 + $0x18] sm:$0xff]  ;;  %v2659_v33 = vld [vmem:[%s3579_s19] sm:$0xff]  ;;  %s3587_s0 = sld [smem:[#allocation35_spill]] }
 0x169   : > { %v2664_v31 = vld [vmem:[%s3579_s19 + $0x28] sm:$0xff]  ;;  %v2666_v32 = vld [vmem:[%s3579_s19 + $0x38] sm:$0xff]  ;;  %1222 = vmatpush.bf16.msra.mxu0 %v2660_v29  ;;  %1247 = vmatpush.bf16.msra.mxu1 %v2662_v30  ;;  %v2661_v34 = vld [vmem:[%s3579_s19 + $0x10] sm:$0xff] }
 0x16a   : > { %v3247_v35 = vld [vmem:[#allocation2] sm:$0xff]  ;;  %1272 = vmatpush.bf16.msra.mxu2 %v2664_v31  ;;  %1297 = vmatpush.bf16.msra.mxu3 %v2666_v32  ;;  %v2665_v37 = vld [vmem:[%s3579_s19 + $0x30] sm:$0xff]  ;;  %v2668_v38 = vld [vmem:[%s3580_s25 + $0x8] sm:$0xff] }
 0x16b   : > { %v2663_v36 = vld [vmem:[%s3579_s19 + $0x20] sm:$0xff]  ;;  %v2670_v39 = vld [vmem:[%s3580_s25 + $0x18] sm:$0xff]  ;;  %v1167_v40 = vpack.c.bf16 %v3247_v35, %v3247_v35  ;;  %v2672_v41 = vld [vmem:[%s3580_s25 + $0x28] sm:$0xff] }
 0x16c   : > { %v2674_v42 = vld [vmem:[%s3580_s25 + $0x38] sm:$0xff]  ;;  %v2667_v43 = vld [vmem:[%s3580_s25] sm:$0xff]  ;;  %v2669_v44 = vld [vmem:[%s3580_s25 + $0x10] sm:$0xff] }
 0x16d   : > { %1223 = vmatpush.bf16.msra.mxu0 %v2659_v33  ;;  %1248 = vmatpush.bf16.msra.mxu1 %v2661_v34  ;;  %v2671_v45 = vld [vmem:[%s3580_s25 + $0x20] sm:$0xff]  ;;  %v2673_v46 = vld [vmem:[%s3580_s25 + $0x30] sm:$0xff]  ;;  %s3585_s7 = scalar_lea.vmem %s3584_s10, %s3583_s30  ;;  %s3590_s25 = scalar_lea.vmem %s3483_s13, %s3135_s2 }
 0x16e   : > { %1273 = vmatpush.bf16.msra.mxu2 %v2663_v36  ;;  %1298 = vmatpush.bf16.msra.mxu3 %v2665_v37  ;;  %v2778_v61 = vld [vmem:[%s3581_s11] ss:$0 sm:$0xff]  ;;  %v2779_v62 = vld [vmem:[%s3581_s11 + $0x1] ss:$0 sm:$0xff]  ;;  %v2780_v9 = vld [vmem:[%s3581_s11 + $0x2] ss:$0 sm:$0xff]  ;;  %s3588_s3 = scalar_lea.vmem %s3587_s0, %s3135_s2  ;;  %s3591_s30 = scalar_lea.vmem %s3485_s15, %s3135_s2 }
 0x16f   : > { %v2775_v5 = vld [vmem:[%s3582_s9 + $0x1] ss:$0 sm:$0xff]  ;;  %v2774_v8 = vld [vmem:[%s3582_s9] ss:$0 sm:$0xff]  ;;  %v2781_v10 = vld [vmem:[%s3581_s11 + $0x3] ss:$0 sm:$0xff] }
 0x170   : > { %2485 = vmatmul.msk.bf16.vlgmr.msra.gmra.mxu0 %vm1212_vm5, %v1167_v40  ;;  %2494 = vmatmul.msk.bf16.vlgmr.msra.gmra.mxu1 %vm1212_vm5, %v1167_v40  ;;  %v2776_v22 = vld [vmem:[%s3582_s9 + $0x2] ss:$0 sm:$0xff]  ;;  %v2777_v23 = vld [vmem:[%s3582_s9 + $0x3] ss:$0 sm:$0xff]  ;;  %v2782_v36 = vld [vmem:[%s3175_s6] ss:$0 sm:$0xff] }
 0x171   : > { %1354 = vmatpush.bf16.msrb.mxu0 %v2668_v38  ;;  %1379 = vmatpush.bf16.msrb.mxu1 %v2670_v39  ;;  %v2783_v37 = vld [vmem:[%s3175_s6 + $0x1] ss:$0 sm:$0xff]  ;;  %s3594_s0 = sld [smem:[#allocation8_spill]] }
 0x172   : > { %2503 = vmatmul.msk.bf16.vlgmr.msra.gmra.mxu2 %vm1212_vm5, %v1167_v40  ;;  %2512 = vmatmul.msk.bf16.vlgmr.msra.gmra.mxu3 %vm1212_vm5, %v1167_v40 }
 0x173   : > { %1404 = vmatpush.bf16.msrb.mxu2 %v2672_v41  ;;  %1429 = vmatpush.bf16.msrb.mxu3 %v2674_v42  ;;  %v2784_v42 = vld [vmem:[%s3175_s6 + $0x2] ss:$0 sm:$0xff] }
 0x175   : > { %1355 = vmatpush.bf16.msrb.mxu0 %v2667_v43  ;;  %1380 = vmatpush.bf16.msrb.mxu1 %v2669_v44 }
 0x177   : > { %1405 = vmatpush.bf16.msrb.mxu2 %v2671_v45  ;;  %1430 = vmatpush.bf16.msrb.mxu3 %v2673_v46  ;;  %p2623_p1 = scmp.ne.s32.totalorder %s3594_s0, 1 }
 0x178   : > { %s3596_s29 = sld [smem:[#allocation40_spill]] (!%p2623_p1) }
 0x179   : > { %1486 = vmatpush.bf16.msra.mxu0 %v2676_v48  ;;  %1511 = vmatpush.bf16.msra.mxu1 %v2678_v49  ;;  %s3597_s11 = sld [smem:[#allocation42_spill]] (!%p2623_p1) }
 0x17a   : > { %s3599_s26 = sld [smem:[#allocation41_spill]] (!%p2623_p1) }
 0x17b   : > { %1536 = vmatpush.bf16.msra.mxu2 %v2680_v47  ;;  %1561 = vmatpush.bf16.msra.mxu3 %v2682_v53  ;;  %v2785_v53 = vld [vmem:[%s3175_s6 + $0x3] ss:$0 sm:$0xff]  ;;  %s3586_s6 = sld [smem:[#allocation23_spill]] }
 0x17c   : > { %s3600_s22 = sld [smem:[#allocation43_spill]] (!%p2623_p1) }
 0x17d   : > { %1487 = vmatpush.bf16.msra.mxu0 %v2675_v51  ;;  %1512 = vmatpush.bf16.msra.mxu1 %v2677_v52 }
 0x17f   : > { %1537 = vmatpush.bf16.msra.mxu2 %v2679_v50  ;;  %1562 = vmatpush.bf16.msra.mxu3 %v2681_v54 }
 0x180   : > { %2521 = vmatmul.msk.bf16.vlgmr.msrb.gmra.mxu0 %vm1212_vm5, %v1167_v40  ;;  %2530 = vmatmul.msk.bf16.vlgmr.msrb.gmra.mxu1 %vm1212_vm5, %v1167_v40 }
 0x182   : > { %2539 = vmatmul.msk.bf16.vlgmr.msrb.gmra.mxu2 %vm1212_vm5, %v1167_v40  ;;  %2548 = vmatmul.msk.bf16.vlgmr.msrb.gmra.mxu3 %vm1212_vm5, %v1167_v40 }
 0x190   : > { %2557 = vmatmul.msk.bf16.vlgmr.msra.gmra.mxu0 %vm1212_vm5, %v1167_v40  ;;  %2566 = vmatmul.msk.bf16.vlgmr.msra.gmra.mxu1 %vm1212_vm5, %v1167_v40 }
 0x192   : > { %2575 = vmatmul.msk.bf16.vlgmr.msra.gmra.mxu2 %vm1212_vm5, %v1167_v40  ;;  %2584 = vmatmul.msk.bf16.vlgmr.msra.gmra.mxu3 %vm1212_vm5, %v1167_v40 }
 0x1ed   : > { %v1225_v55 = vpop.f32.mrf.mxu0  ;;  %v1250_v56 = vpop.f32.mrf.mxu1 }
 0x1ee   : > { %v1251_v13 = vadd.f32 %v2775_v5, %v1250_v56  ;;  %v1226_v16 = vadd.f32 %v2774_v8, %v1225_v55 }
 0x1f0   : > { %v1569_v21 = vpack.c.bf16 %v1251_v13, %v1251_v13  ;;  %v1568_v26 = vpack.c.bf16 %v1226_v16, %v1226_v16 }
 0x1f5   : > { %v1275_v57 = vpop.f32.mrf.mxu2  ;;  %v1300_v58 = vpop.f32.mrf.mxu3 }
 0x1f6   : > { %v1227_v59 = vpop.f32.mrf.mxu0  ;;  %v1252_v60 = vpop.f32.mrf.mxu1  ;;  %v1276_v29 = vadd.f32 %v2776_v22, %v1275_v57  ;;  %v1301_v30 = vadd.f32 %v2777_v23, %v1300_v58 }
 0x1f7   : > { %v2786_v60 = vld [vmem:[%s3585_s7] ss:$0 sm:$0xff]  ;;  %s3598_s7 = sld [smem:[#allocation39_spill]] (!%p2623_p1) }
 0x1f8   : > { %v1570_v33 = vpack.c.bf16 %v1276_v29, %v1276_v29  ;;  %v1571_v34 = vpack.c.bf16 %v1301_v30, %v1301_v30 }
 0x1fd   : > { %v1277_v63 = vpop.f32.mrf.mxu2  ;;  %v1302_v0 = vpop.f32.mrf.mxu3 }
 0x1fe   : > { %v1357_v1 = vpop.f32.mrf.mxu0  ;;  %v1382_v2 = vpop.f32.mrf.mxu1 }
 0x1ff   : > { %v1358_v3 = vadd.f32 %v2778_v61, %v1357_v1  ;;  %v1383_v4 = vadd.f32 %v2779_v62, %v1382_v2 }
 0x201   : > { %v1572_v6 = vpack.c.bf16 %v1358_v3, %v1358_v3  ;;  %v1573_v7 = vpack.c.bf16 %v1383_v4, %v1383_v4 }
 0x203   : > { %v1585_v11 = vsel %vm1580_vm6, %v1572_v6, 0  ;;  %v1604_v12 = vsel %vm1580_vm6, %v1573_v7, 0 }
 0x204   : > { %1594 = vmatpush.bf16.xpose.msrb.mxu0 %v1585_v11  ;;  %1613 = vmatpush.bf16.xpose.msrb.mxu1 %v1604_v12 }
 0x205   : > { %v1407_v14 = vpop.f32.mrf.mxu2  ;;  %v1432_v15 = vpop.f32.mrf.mxu3 }
 0x206   : > { %v1408_v17 = vadd.f32 %v2780_v9, %v1407_v14  ;;  %v1433_v18 = vadd.f32 %v2781_v10, %v1432_v15  ;;  %v1359_v19 = vpop.f32.mrf.mxu0  ;;  %v1384_v20 = vpop.f32.mrf.mxu1 }
 0x208   : > { %v1574_v24 = vpack.c.bf16 %v1408_v17, %v1408_v17  ;;  %v1575_v25 = vpack.c.bf16 %v1433_v18, %v1433_v18 }
 0x20a   : > { %v1623_v27 = vsel %vm1580_vm6, %v1574_v24, 0  ;;  %v1642_v28 = vsel %vm1580_vm6, %v1575_v25, 0 }
 0x20b   : > { %1632 = vmatpush.bf16.xpose.msrb.mxu2 %v1623_v27  ;;  %1651 = vmatpush.bf16.xpose.msrb.mxu3 %v1642_v28 }
 0x20c   : > { %2585 = vmatmul.msk.bf16.vlgmr.msrb.gmra.mxu0 %vm1580_vm6, %v1568_v26  ;;  %2586 = vmatmul.msk.bf16.vlgmr.msrb.gmra.mxu1 %vm1580_vm6, %v1569_v21 }
 0x20d   : > { %v1409_v31 = vpop.f32.mrf.mxu2  ;;  %v1434_v32 = vpop.f32.mrf.mxu3 }
 0x20e   : > { %v1489_v38 = vpop.f32.mrf.mxu0  ;;  %v1514_v39 = vpop.f32.mrf.mxu1 }
 0x20f   : > { %v1490_v40 = vadd.f32 %v2782_v36, %v1489_v38  ;;  %v1515_v41 = vadd.f32 %v2783_v37, %v1514_v39 }
 0x211   : > { %v1705_v43 = vpack.c.bf16 %v1490_v40, %v1490_v40  ;;  %v1706_v44 = vpack.c.bf16 %v1515_v41, %v1515_v41 }
 0x212   : > { %2587 = vmatmul.msk.bf16.vlgmr.msrb.gmra.mxu2 %vm1580_vm6, %v1570_v33  ;;  %2588 = vmatmul.msk.bf16.vlgmr.msrb.gmra.mxu3 %vm1580_vm6, %v1571_v34 }
 0x213   : > { %v1714_v46 = vsel %vm1712_vm7, %v1705_v43, 0  ;;  %v1733_v47 = vsel %vm1712_vm7, %v1706_v44, 0 }
 0x214   : > { %1723 = vmatpush.bf16.msra.mxu0 %v1714_v46  ;;  %1742 = vmatpush.bf16.msra.mxu1 %v1733_v47 }
 0x215   : > { %v1539_v45 = vpop.f32.mrf.mxu2  ;;  %v1564_v54 = vpop.f32.mrf.mxu3 }
 0x216   : > { %v1540_v48 = vadd.f32 %v2784_v42, %v1539_v45  ;;  %v1491_v50 = vpop.f32.mrf.mxu0  ;;  %v1516_v51 = vpop.f32.mrf.mxu1  ;;  %v1565_v56 = vadd.f32 %v2785_v53, %v1564_v54  ;;  %v1792_v54 = vld [vmem:[%s3586_s6 + $0x8] sm:$0xf] }
 0x217   : > { %v1790_v50 = vld [vmem:[%s3586_s6] sm:$0xf] }
 0x218   : > { %v1707_v49 = vpack.c.bf16 %v1540_v48, %v1540_v48  ;;  %v1708_v57 = vpack.c.bf16 %v1565_v56, %v1565_v56  ;;  %v1798_v51 = vsel %vm1712_vm7, %v1790_v50, 0  ;;  %v1793_v56 = vld [vmem:[%s3586_s6 + $0xc] sm:$0xf]  ;;  %v2789_v50 = vld [vmem:[%s3590_s25] ss:$0 sm:$0xff] }
 0x219   : > { %1807 = vmatpush.bf16.msrb.mxu0 %v1798_v51 }
 0x21a   : > { %v1752_v52 = vsel %vm1712_vm7, %v1707_v49, 0  ;;  %v1771_v58 = vsel %vm1712_vm7, %v1708_v57, 0  ;;  %v1855_v57 = vsel %vm1712_vm7, %v1793_v56, 0  ;;  %v2687_v56 = vld [vmem:[%s3212_s23 + $0x10] sm:$0xff] }
 0x21b   : > { %1761 = vmatpush.bf16.msra.mxu2 %v1752_v52  ;;  %1780 = vmatpush.bf16.msra.mxu3 %v1771_v58  ;;  %v1791_v52 = vld [vmem:[%s3586_s6 + $0x4] sm:$0xf] }
 0x21c   : > { %v1817_v53 = vsel %vm1712_vm7, %v1791_v52, 0 }
 0x21d   : > { %v1541_v55 = vpop.f32.mrf.mxu2  ;;  %v1566_v59 = vpop.f32.mrf.mxu3  ;;  %1826 = vmatpush.bf16.msrb.mxu1 %v1817_v53 }
 0x21e   : > { %v1836_v55 = vsel %vm1712_vm7, %v1792_v54, 0 }
 0x21f   : > { %1845 = vmatpush.bf16.msrb.mxu2 %v1836_v55  ;;  %1864 = vmatpush.bf16.msrb.mxu3 %v1855_v57  ;;  %v2688_v55 = vld [vmem:[%s3212_s23 + $0x18] sm:$0xff]  ;;  %v2686_v57 = vld [vmem:[%s3212_s23 + $0x8] sm:$0xff] }
 0x289   : > { %v1596_v61 = vpop.f32.mrf.mxu0  ;;  %v1615_v62 = vpop.f32.mrf.mxu1 }
 0x28a   : > { %v1597_v63 = vadd.f32 %v2786_v60, %v1596_v61  ;;  %v1616_v1 = vadd.f32 %v2786_v60, %v1615_v62 }
 0x28c   : > { %v1657_v0 = vsel %vm1580_vm6, %v1597_v63, -inf  ;;  %v1660_v4 = vsel %vm1580_vm6, %v1616_v1, -inf }
 0x28d   : > { %1658 = vmax.xlane.f32.xlu1 %v1657_v0 }
 0x291   : > { %v1598_v2 = vpop.f32.mrf.mxu0  ;;  %v1617_v3 = vpop.f32.mrf.mxu1 }
 0x295   : > { %v1634_v5 = vpop.f32.mrf.mxu2  ;;  %v1653_v6 = vpop.f32.mrf.mxu3  ;;  %1661 = vmax.xlane.f32.xlu1 %v1660_v4 }
 0x296   : > { %v1635_v7 = vadd.f32 %v2786_v60, %v1634_v5  ;;  %v1654_v9 = vadd.f32 %v2786_v60, %v1653_v6 }
 0x298   : > { %v1663_v8 = vsel %vm1580_vm6, %v1635_v7, -inf  ;;  %v1666_v12 = vsel %vm1580_vm6, %v1654_v9, -inf }
 0x299   : > { %1664 = vmax.xlane.f32.xlu0 %v1663_v8 }
 0x29d   : > { %v1636_v10 = vpop.f32.mrf.mxu2  ;;  %v1655_v11 = vpop.f32.mrf.mxu3 }
 0x2a1   : > { %1667 = vmax.xlane.f32.xlu0 %v1666_v12 }
 0x300   : > { %v1659_v13 = vpop.xlane.xlu1 %1658 }
 0x301   : > { %v1669_v14 = vsub.f32 %v1597_v63, %v1659_v13 }
 0x303   : > { %v1673_v15 = vmul.f32 1.442695, %v1669_v14 }
 0x305   : > { %2794 = vpow2.f32 %v1673_v15 }
 0x308   : > { %v1662_v16 = vpop.xlane.xlu1 %1661 }
 0x309   : > { %v1670_v17 = vsub.f32 %v1616_v1, %v1662_v16 }
 0x30b   : > { %v2795_v18 = vpop.eup %2794  ;;  %v1675_v19 = vmul.f32 1.442695, %v1670_v17 }
 0x30c   : > { %v1665_v20 = vpop.xlane.xlu0 %1664  ;;  %v1681_v21 = vsel %vm1580_vm6, %v2795_v18, 0.0 }
 0x30d   : > { %2796 = vpow2.f32 %v1675_v19  ;;  %v1671_v22 = vsub.f32 %v1635_v7, %v1665_v20  ;;  %1682 = vadd.xlane.f32.xlu0 %v1681_v21 }
 0x30f   : > { %v1677_v23 = vmul.f32 1.442695, %v1671_v22 }
 0x311   : > { %2798 = vpow2.f32 %v1677_v23 }
 0x313   : > { %v2797_v24 = vpop.eup %2796 }
 0x314   : > { %v1668_v25 = vpop.xlane.xlu0 %1667  ;;  %v1684_v26 = vsel %vm1580_vm6, %v2797_v24, 0.0 }
 0x315   : > { %v1672_v27 = vsub.f32 %v1654_v9, %v1668_v25  ;;  %1685 = vadd.xlane.f32.xlu1 %v1684_v26  ;;  %v2918_v25 = vmov 32.0  }
 0x317   : > { %v2799_v28 = vpop.eup %2798  ;;  %v1679_v29 = vmul.f32 1.442695, %v1672_v27 }
 0x318   : > { %v1687_v30 = vsel %vm1580_vm6, %v2799_v28, 0.0 }
 0x319   : > { %2800 = vpow2.f32 %v1679_v29  ;;  %1688 = vadd.xlane.f32.xlu2 %v1687_v30 }
 0x31f   : > { %v2801_v31 = vpop.eup %2800 }
 0x320   : > { %v1690_v32 = vsel %vm1580_vm6, %v2801_v31, 0.0 }
 0x321   : > { %1691 = vadd.xlane.f32.xlu2 %v1690_v32 }
 0x380   : > { %v1683_v33 = vpop.xlane.xlu0 %1682 }
 0x381   : > { %2802 = vrcp.f32 %v1683_v33 }
 0x387   : > { %v2803_v34 = vpop.eup %2802 }
 0x388   : > { %v1697_v36 = vmul.f32 %v2803_v34, %v2795_v18  ;;  %v1686_v37 = vpop.xlane.xlu1 %1685  ;;  %v2787_v18 = vld [vmem:[%s3588_s3] ss:$0 sm:$0xff] }
 0x389   : > { %2804 = vrcp.f32 %v1686_v37  ;;  %v2684_v37 = vld [vmem:[%s3198_s24 + $0x8] sm:$0xff] }
 0x38a   : > { %v1701_v38 = vpack.c.bf16 %v1697_v36, %v1697_v36 }
 0x38c   : > { %v1689_v39 = vpop.xlane.xlu2 %1688  ;;  %2589 = vmatmul.msk.bf16.vlgmr.msra.gmra.mxu0 %vm1580_vm6, %v1701_v38  ;;  %v2683_v38 = vld [vmem:[%s3198_s24] sm:$0xff]  ;;  %s3595_s24 = sld [smem:[#allocation38_spill]] (!%p2623_p1) }
 0x38d   : > { %2806 = vrcp.f32 %v1689_v39  ;;  %1952 = vmatpush.bf16.msra.mxu0 %v2684_v37 }
 0x38f   : > { %v2805_v40 = vpop.eup %2804 }
 0x390   : > { %v1698_v41 = vmul.f32 %v2805_v40, %v2797_v24 }
 0x391   : > { %1953 = vmatpush.bf16.msra.mxu0 %v2683_v38 }
 0x392   : > { %v1702_v42 = vpack.c.bf16 %v1698_v41, %v1698_v41 }
 0x393   : > { %v2807_v43 = vpop.eup %2806 }
 0x394   : > { %v1699_v44 = vmul.f32 %v2807_v43, %v2799_v28  ;;  %v1692_v45 = vpop.xlane.xlu2 %1691  ;;  %2590 = vmatmul.msk.bf16.vlgmr.msra.gmra.mxu1 %vm1580_vm6, %v1702_v42 }
 0x395   : > { %2808 = vrcp.f32 %v1692_v45  ;;  %2013 = vmatpush.bf16.msra.mxu1 %v2688_v55 }
 0x396   : > { %v1703_v46 = vpack.c.bf16 %v1699_v44, %v1699_v44  ;;  %2810 = vrcp.f32 %v2918_v25 }
 0x398   : > { %2591 = vmatmul.msk.bf16.vlgmr.msra.gmra.mxu2 %vm1580_vm6, %v1703_v46 }
 0x399   : > { %2014 = vmatpush.bf16.msra.mxu1 %v2687_v56 }
 0x39b   : > { %v2809_v47 = vpop.eup %2808 }
 0x39c   : > { %v1700_v48 = vmul.f32 %v2809_v47, %v2801_v31  ;;  %v2811_v26 = vpop.eup %2810 }
 0x39d   : > { %v1889_v27 = vmul.f32 32.0, %v2811_v26  ;;  %vm1893_vm8 = vweird.f32 %v2811_v26  ;;  %2015 = vmatpush.bf16.msra.mxu1 %v2686_v57 }
 0x39e   : > { %v1704_v49 = vpack.c.bf16 %v1700_v48, %v1700_v48  ;;  %v2788_v48 = vld [vmem:[%s3589_s8] ss:$0 sm:$0xff] }
 0x39f   : > { %v1890_v28 = vsub.f32 1.0, %v1889_v27 }
 0x3a0   : > { %2592 = vmatmul.msk.bf16.vlgmr.msra.gmra.mxu3 %vm1580_vm6, %v1704_v49 }
 0x3a1   : > { %v1891_v29 = vmul.f32 %v2811_v26, %v1890_v28 }
 0x3a3   : > { %v1892_v30 = vadd.f32 %v2811_v26, %v1891_v29  ;;  %v2792_v29 = vld [vmem:[%s1111_s21] ss:$0 sm:$0xff] }
 0x3a5   : > { %v3345_v31 = vsel %vm1893_vm8, %v2811_v26, %v1892_v30 }
 0x409   : > { %v1725_v58 = vpop.f32.mrf.mxu0 }
 0x40a   : > { %v1786_v59 = vpack.c.bf16 %v1725_v58, %v1725_v58  ;;  %v2685_v58 = vld [vmem:[%s3212_s23] sm:$0xff] }
 0x40b   : > { %2016 = vmatpush.bf16.msra.mxu1 %v2685_v58 }
 0x40c   : > { %2593 = vmatmul.msk.bf16.vlgmr.msrb.gmra.mxu0 %vm1580_vm6, %v1786_v59  ;;  %v2790_v59 = vld [vmem:[%s3591_s30] ss:$0 sm:$0xff] }
 0x411   : > { %v1727_v60 = vpop.f32.mrf.mxu0  ;;  %v1744_v61 = vpop.f32.mrf.mxu1 }
 0x412   : > { %v1787_v62 = vpack.c.bf16 %v1744_v61, %v1744_v61 }
 0x414   : > { %2594 = vmatmul.msk.bf16.vlgmr.msrb.gmra.mxu1 %vm1580_vm6, %v1787_v62 }
 0x419   : > { %v1746_v63 = vpop.f32.mrf.mxu1 }
 0x41b   : > { %v1763_v0 = vpop.f32.mrf.mxu2 }
 0x41c   : > { %v1788_v1 = vpack.c.bf16 %v1763_v0, %v1763_v0 }
 0x41e   : > { %2595 = vmatmul.msk.bf16.vlgmr.msrb.gmra.mxu2 %vm1580_vm6, %v1788_v1 }
 0x423   : > { %v1765_v2 = vpop.f32.mrf.mxu2  ;;  %v1782_v3 = vpop.f32.mrf.mxu3 }
 0x424   : > { %v1789_v4 = vpack.c.bf16 %v1782_v3, %v1782_v3 }
 0x426   : > { %2596 = vmatmul.msk.bf16.vlgmr.msrb.gmra.mxu3 %vm1580_vm6, %v1789_v4 }
 0x42b   : > { %v1784_v5 = vpop.f32.mrf.mxu3 }
 0x489   : > { %v1809_v6 = vpop.f32.mrf.mxu0 }
 0x48a   : > { %v1870_v12 = vsel %vm1212_vm5, %v1809_v6, 0.0 }
 0x491   : > { %v1811_v7 = vpop.f32.mrf.mxu0  ;;  %v1828_v8 = vpop.f32.mrf.mxu1 }
 0x492   : > { %v1871_v11 = vsel %vm1212_vm5, %v1828_v8, 0.0 }
 0x493   : > { %v1872_v14 = vadd.f32 %v1871_v11, %v1870_v12 }
 0x499   : > { %v1830_v9 = vpop.f32.mrf.mxu1 }
 0x49a   : > { %v2791_v9 = vld [vmem:[%s3592_s20] ss:$0 sm:$0xff] }
 0x4a1   : > { %v1847_v10 = vpop.f32.mrf.mxu2 }
 0x4a2   : > { %v1873_v13 = vsel %vm1212_vm5, %v1847_v10, 0.0 }
 0x4a3   : > { %v1874_v15 = vadd.f32 %v1873_v13, %v1872_v14 }
 0x4a9   : > { %v1849_v16 = vpop.f32.mrf.mxu2  ;;  %v1866_v17 = vpop.f32.mrf.mxu3 }
 0x4aa   : > { %v1875_v19 = vsel %vm1212_vm5, %v1866_v17, 0.0 }
 0x4ab   : > { %v1876_v20 = vadd.f32 %v1875_v19, %v1874_v15 }
 0x4ad   : > { %v1881_v21 = vadd.f32 %v2787_v18, %v1876_v20 }
 0x4af   : > { %v1882_v22 = vadd.f32 %v1881_v21, %v3247_v35 }
 0x4b1   : > { %v1868_v23 = vpop.f32.mrf.mxu3  ;;  %v1885_v24 = vsel %vm1212_vm5, %v1882_v22, 0.0 }
 0x4b2   : > { %1886 = vadd.xlane.f32.xlu2 %v1885_v24 }
 0x525   : > { %v1887_v32 = vpop.xlane.xlu2 %1886 }
 0x526   : > { %v1895_v33 = vmul.f32 %v3345_v31, %v1887_v32 }
 0x528   : > { %v1896_v35 = vsub.f32 %v1882_v22, %v1895_v33 }
 0x52a   : > { %v1897_v34 = vmul.f32 %v1896_v35, %v1896_v35 }
 0x52c   : > { %v1898_v36 = vsel %vm1212_vm5, %v1897_v34, 0.0 }
 0x52d   : > { %1899 = vadd.xlane.f32.xlu0 %v1898_v36 }
 0x5a0   : > { %v1900_v39 = vpop.xlane.xlu0 %1899 }
 0x5a1   : > { %v1901_v40 = vmul.f32 %v1900_v39, %v3345_v31 }
 0x5a3   : > { %v1902_v41 = vadd.f32 1e-12, %v1901_v40 }
 0x5a5   : > { %2812 = vrsqrt.f32 %v1902_v41  ;;  %vm1909_vm10 = vweird.f32 %v1902_v41 }
 0x5ab   : > { %v2813_v42 = vpop.eup %2812 }
 0x5ac   : > { %v1904_v43 = vmul.f32 %v2813_v42, %v1902_v41  ;;  %vm1910_vm9 = vweird.f32 %v2813_v42 }
 0x5ad   : > { %vm1911_vm11 = vmor %vm1909_vm10, %vm1910_vm9 }
 0x5ae   : > { %v1905_v44 = vmul.f32 %v2813_v42, %v1904_v43 }
 0x5b0   : > { %v1906_v45 = vmul.f32 0.5, %v1905_v44 }
 0x5b2   : > { %v1907_v46 = vsub.f32 1.5, %v1906_v45 }
 0x5b4   : > { %v1908_v47 = vmul.f32 %v2813_v42, %v1907_v46 }
 0x5b6   : > { %v1912_v49 = vsel %vm1911_vm11, %v2813_v42, %v1908_v47 }
 0x5b7   : > { %v1913_v51 = vmul.f32 %v1912_v49, %v1896_v35 }
 0x5b9   : > { %v1917_v52 = vmul.f32 %v2788_v48, %v1913_v51 }
 0x5bb   : > { %v1921_v53 = vadd.f32 %v2789_v50, %v1917_v52 }
 0x5bd   : > { %v1922_v54 = vpack.c.bf16 %v1921_v53, %v1921_v53 }
 0x5bf   : > { %2605 = vmatmul.msk.bf16.vlgmr.msra.gmra.mxu0 %vm1212_vm5, %v1922_v54 }
 0x63c   : > { %v1955_v60 = vpop.f32.mrf.mxu0 }
 0x63d   : > { %v1956_v61 = vadd.f32 %v2790_v59, %v1955_v60 }
 0x63f   : > { %v1959_v62 = vmul.f32 %v1956_v61, %v1956_v61 }
 0x641   : > { %v1960_v63 = vmul.f32 %v1959_v62, %v1956_v61 }
 0x643   : > { %v1961_v0 = vmul.f32 0.044715, %v1960_v63 }
 0x644   : > { %v1957_v1 = vpop.f32.mrf.mxu0 }
 0x645   : > { %v1962_v2 = vadd.f32 %v1961_v0, %v1956_v61 }
 0x647   : > { %v1963_v3 = vmul.f32 0.7978846, %v1962_v2 }
 0x649   : > { %2814 = vtanh.f32 %v1963_v3 }
 0x64f   : > { %v2815_v4 = vpop.eup %2814 }
 0x650   : > { %v1965_v5 = vadd.f32 1.0, %v2815_v4 }
 0x652   : > { %v1966_v6 = vmul.f32 0.5, %v1965_v5 }
 0x654   : > { %v1967_v7 = vmul.f32 %v1966_v6, %v1956_v61 }
 0x656   : > { %v1968_v8 = vpack.c.bf16 %v1967_v7, %v1967_v7 }
 0x658   : > { %2622 = vmatmul.msk.bf16.vlgmr.msra.gmra.mxu1 %vm2005_vm12, %v1968_v8 }
 0x6d5   : > { %v2018_v10 = vpop.f32.mrf.mxu1 }
 0x6d6   : > { %v2019_v11 = vadd.f32 %v2791_v9, %v2018_v10 }
 0x6d8   : > { %v2022_v12 = vadd.f32 %v2019_v11, %v1921_v53 }
 0x6da   : > { %v2025_v13 = vsel %vm1212_vm5, %v2022_v12, 0.0 }
 0x6db   : > { %2026 = vadd.xlane.f32.xlu1 %v2025_v13 }
 0x6dd   : > { %v2020_v14 = vpop.f32.mrf.mxu1 }
 0x74e   : > { %v2027_v15 = vpop.xlane.xlu1 %2026 }
 0x74f   : > { %v2028_v16 = vmul.f32 %v2027_v15, %v3345_v31 }
 0x751   : > { %v2029_v17 = vsub.f32 %v2022_v12, %v2028_v16 }
 0x753   : > { %v2030_v18 = vmul.f32 %v2029_v17, %v2029_v17 }
 0x755   : > { %v2031_v19 = vsel %vm1212_vm5, %v2030_v18, 0.0 }
 0x756   : > { %2032 = vadd.xlane.f32.xlu2 %v2031_v19 }
 0x7c9   : > { %v2033_v20 = vpop.xlane.xlu2 %2032 }
 0x7ca   : > { %v2034_v21 = vmul.f32 %v2033_v20, %v3345_v31  ;;  %v2793_v31 = vld [vmem:[%s1114_s27] ss:$0 sm:$0xff] }
 0x7cc   : > { %v2035_v22 = vadd.f32 1e-12, %v2034_v21 }
 0x7ce   : > { %2816 = vrsqrt.f32 %v2035_v22  ;;  %vm2042_vm14 = vweird.f32 %v2035_v22 }
 0x7d4   : > { %v2817_v23 = vpop.eup %2816 }
 0x7d5   : > { %v2037_v24 = vmul.f32 %v2817_v23, %v2035_v22  ;;  %vm2043_vm13 = vweird.f32 %v2817_v23 }
 0x7d6   : > { %vm2044_vm15 = vmor %vm2042_vm14, %vm2043_vm13 }
 0x7d7   : > { %v2038_v25 = vmul.f32 %v2817_v23, %v2037_v24 }
 0x7d9   : > { %v2039_v26 = vmul.f32 0.5, %v2038_v25 }
 0x7db   : > { %v2040_v27 = vsub.f32 1.5, %v2039_v26 }
 0x7dd   : > { %v2041_v28 = vmul.f32 %v2817_v23, %v2040_v27 }
 0x7df   : > { %v2045_v30 = vsel %vm2044_vm15, %v2817_v23, %v2041_v28 }
 0x7e0   : > { %v2046_v32 = vmul.f32 %v2045_v30, %v2029_v17 }
 0x7e2   : > { %v2050_v33 = vmul.f32 %v2792_v29, %v2046_v32  ;;  %2059 = sbr.rel (%p2623_p1) target bundleno = 2308 (0x904), region = 132 }
 0x7e4   : > { %v2054_v35 = vadd.f32 %v2793_v31, %v2050_v33 }
 0x7e6   : > { %2055 = vst.msk [vmem:[#allocation2] sm:$0xff] %vm1212_vm5, %v2054_v35 }
 0x7e7   : > { %v2692_v34 = vld [vmem:[%s3595_s24 + $0x8] sm:$0xff]  ;;  %v2691_v36 = vld [vmem:[%s3595_s24] sm:$0xff]  ;;  %v2060_v37 = vpack.c.bf16 %v2054_v35, %v2054_v35 }
 0x7e8   : > { %2121 = vmatpush.bf16.msra.mxu1 %v2692_v34  ;;  %v2690_v38 = vld [vmem:[%s3596_s29 + $0x8] sm:$0xff]  ;;  %v2689_v40 = vld [vmem:[%s3596_s29] sm:$0xff] }
 0x7e9   : > { %2090 = vmatpush.bf16.msra.mxu0 %v2690_v38  ;;  %v2694_v39 = vld [vmem:[%s3597_s11 + $0x8] sm:$0xff]  ;;  %v2693_v41 = vld [vmem:[%s3597_s11] sm:$0xff] }
 0x7ea   : > { %2156 = vmatpush.bf16.msra.mxu2 %v2694_v39  ;;  %v2102_v42 = vld [vmem:[%s3598_s7] sm:$0x1] }
 0x7eb   : > { %v2818_v48 = vld [vmem:[%s3599_s26] ss:$0 sm:$0xff] }
 0x7ec   : > { %2122 = vmatpush.bf16.msra.mxu1 %v2691_v36  ;;  %v2134_v52 = vld [vmem:[%s3600_s22] sm:$0x1] }
 0x7ed   : > { %2091 = vmatpush.bf16.msra.mxu0 %v2689_v40 }
 0x7ee   : > { %2157 = vmatpush.bf16.msra.mxu2 %v2693_v41 }
 0x7ef   : > { %2641 = vmatmul.msk.bf16.vlgmr.msra.gmra.mxu1 %vm1212_vm5, %v2060_v37 }
 0x7f0   : > { %2632 = vmatmul.msk.bf16.vlgmr.msra.gmra.mxu0 %vm1212_vm5, %v2060_v37 }
 0x86c   : > { %v2124_v43 = vpop.f32.mrf.mxu1 }
 0x86d   : > { %v2125_v44 = vadd.f32 %v2124_v43, %v2102_v42  ;;  %v2093_v49 = vpop.f32.mrf.mxu0 }
 0x86e   : > { %v2094_v50 = vadd.f32 %v2818_v48, %v2093_v49 }
 0x86f   : > { %2819 = vtanh.f32 %v2125_v44 }
 0x870   : > { %2097 = vst [vmem:[%s3225_s14] sm:$0xff] %v2094_v50 }
 0x874   : > { %v2126_v45 = vpop.f32.mrf.mxu1 }
 0x875   : > { %v2820_v46 = vpop.eup %2819  ;;  %v2095_v51 = vpop.f32.mrf.mxu0 }
 0x876   : > { %v2129_v47 = vpack.c.bf16 %v2820_v46, %v2820_v46 }
 0x878   : > { %2650 = vmatmul.msk.bf16.vlgmr.msra.gmra.mxu2 %vm1212_vm5, %v2129_v47 }
 0x8fb   : > { %v2159_v53 = vpop.f32.mrf.mxu2 }
 0x8fc   : > { %v2160_v54 = vadd.f32 %v2159_v53, %v2134_v52 }
 0x8fe   : > { %2163 = vst [vmem:[%s3229_s5] sm:$0x1] %v2160_v54 }
 0x903   : > { %v2161_v55 = vpop.f32.mrf.mxu2 }
 0x904 PF: > { %s3601_s21 = sld [smem:[#allocation9_spill]]  ;;  %s2182_s9 = sshll.u32 %s3229_s5, 4  ;;  %s2183_s9 = int_to_ptr.vmem [resolvable:$true] %s2182_s9 }
 0x905   : > { %s3602_s27 = sld [smem:[#allocation45_spill]]  ;;  %s3604_s30 = sand.u32 1, %s2891_s4  }
 0x906   : > { %s2169_s23 = scalar_lea.sflag [#allocation4], %s3604_s30 }
 0x90b   : > { %s2180_s25 = scalar_lea.hbm %s3602_s27, %s3601_s21  ;;  %s2841_s6 = scalar_lea.hbm %s3602_s27, 2 }
 0x90c   : > { %s2184_s14 = sshll.u32 %s2180_s25, 4  ;;  %s2185_s14 = int_to_ptr.hbm [resolvable:$true] %s2184_s14 }
 0x90d   : > { %s2835_s28 = sshra.s32 %s2185_s14, 4  ;;  %s2836_s28 = int_to_ptr.hbm [resolvable:$true] %s2835_s28 }
 0x90e   : > { %s2837_s20 = scalar_lea.hbm %s2836_s28, 1  ;;  %p2842_p6 = scmp.lt.s32.totalorder %s2836_s28, %s3602_s27 }
 0x90f   : > { %p2838_p2 = scmp.ne.s32.totalorder %s2836_s28, %s2837_s20  ;;  %p2843_p7 = scmp.lt.s32.totalorder %s2841_s6, %s2837_s20 }
 0x911   : > { %p2839_p4 = pnand %p2838_p2, %p3108_p3  ;;  %p2844_p8 = por %p2843_p7, %p2842_p6 }
 0x913   : > { %p2840_p5 = pneg %p2839_p4 }
 0x915   : > { %p2845_p10 = pnand %p2844_p8, %p2840_p5 }
 0x917   : > { %2848 = shalt.err (!%p2845_p10)
}
 0x918   : > { %2695 = dma.vmem_to_hbm [thread:$0]  (%p3108_p3), %s2183_s9, 16, %s2185_s14, %s2169_s23  }
 0x919 PF: > { %s3605_s5 = sld [smem:[#allocation12_spill]] }
 0x91a   : > { %s3606_s0 = sld [smem:[#allocation6_spill]] }
 0x91f   : > { %p2701_p11 = scmp.ge.s32.totalorder %s3605_s5, 2 }
 0x920   : > { %s2203_s22 = sand.u32 1, %s3606_s0  }
 0x921   : > { %p2698_p12 = pnand %p2701_p11, %p3118_p9  ;;  %s2204_s21 = scalar_lea.sflag [#allocation4], %s2203_s22 }
 0x923   : > { %p2699_p13 = pneg %p2698_p12 }
 0x925   : > { %2882 = dma.done.wait (%p2699_p13), %s2204_s21, 16  }
 0x926   : > { %2884 = vsyncadd (%p2699_p13), %s2204_s21, 4294967280  ;;  %s41_s0 = sadd.s32 1, %s3605_s5   ;;  %s3608_s8 = sld [smem:[#allocation7_spill]] }
 0x927   : > { %p38_p0 = scmp.ge.s32.totalorder %s41_s0, 6   ;;  %s3609_s2 = sld [smem:[#allocation17_spill]] }
 0x928   : > { %s3610_s30 = sld [smem:[#allocation10_spill]]  ;;  %s3614_s7 = smov %s2891_s4 }
 0x929   : > { %s3611_s9 = sld [smem:[#allocation11_spill]]  ;;  %40 = sbr.rel (!%p38_p0) target bundleno = 28 (0x1c), region = 230 }
 0x92a   : > { %s3612_s5 = sld [smem:[#allocation13_spill]] }
 0x92b   : > { %s3613_s28 = sld [smem:[#allocation15_spill]] }
 0x92c   : > { %s3615_s4 = smov %s3608_s8 }
 0x92d   : > { %s3616_s8 = smov %s3609_s2 }
 0x92e   :  { %2209 = vsyncpa [#allocation4], 1 }
 0x92f   :  { %2211 = vsyncpa [#allocation4 + $0x1], 1 }

</bundles_post_ra>
